<compile_context>
chip_gen: v7x
topology: tpu7x:2x2x1
jax: 0.10.0
libtpu: 0.0.40
codegen_flags: <defaults>
</compile_context>

<pallas_src>
import functools
import math

import jax
import jax.numpy as jnp
import numpy as np
from jax.experimental import pallas as pl
from jax.experimental.pallas import tpu as pltpu


def _sa_kernel(x_ref, m_ref, o_ref, sum_ref, max_ref, scan_ref, mcan_ref,
               cat_ref, *, H, W, n_ct, k, pad):
    """Fused channel-reduce + kxk conv + sigmoid for one (batch, channel-tile).

    x_ref   : (1, TC, H*W)  lane-dense input channel tile
    m_ref   : (2*k*W, W)    stacked banded conv matrices (avg rows carry 1/C)
    o_ref   : (1, 1, H, W)  sigmoid(conv) output (written on last channel tile)
    sum_ref : (1, H*W)      running channel sum  (flat, lane-dense)
    max_ref : (1, H*W)      running channel max  (flat, lane-dense)
    scan_ref: (HP, W)       sum canvas, zero border rows (finalize only)
    mcan_ref: (HP, W)       max canvas, zero border rows (finalize only)
    cat_ref : (H, 2*k*W)    lane-concatenated conv operand (finalize only)

    NOTE: the channel-tile grid axis MUST stay "arbitrary" (sequential) —
    sum_ref/max_ref persist across it and are re-initialised at ct == 0.
    """
    ct = pl.program_id(1)

    @pl.when(ct == 0)
    def _init():
        sum_ref[...] = jnp.zeros_like(sum_ref)
        max_ref[...] = jnp.full_like(max_ref, -jnp.inf)

    # Hot loop: dense (TC, H*W) channel reduction, f32 accumulation.
    x = x_ref[0].astype(jnp.float32)
    sum_ref[...] = sum_ref[...] + jnp.sum(x, axis=0, keepdims=True)
    max_ref[...] = jnp.maximum(max_ref[...], jnp.max(x, axis=0, keepdims=True))

    @pl.when(ct == n_ct - 1)
    def _conv_and_store():
        # Unflatten the reduced maps into zero-bordered (HP, W) canvases.  The
        # zero border rows provide the conv's H-direction zero padding (the
        # W-direction padding is folded into the banded matrices).
        scan_ref[...] = jnp.zeros_like(scan_ref)
        mcan_ref[...] = jnp.zeros_like(mcan_ref)
        for y in range(H):                           # static, finalize-only
            scan_ref[8 + y:9 + y, :] = sum_ref[0:1, y * W:(y + 1) * W]
            mcan_ref[8 + y:9 + y, :] = max_ref[0:1, y * W:(y + 1) * W]

        # Gather the 2*k H-shifted (H, W) slices into a single (H, 2*k*W)
        # operand so the whole conv is ONE MXU matmul (contraction = 2*k*W).
        for dy in range(k):
            r0 = 8 + dy - pad
            cat_ref[:, dy * W:(dy + 1) * W] = scan_ref[r0:r0 + H, :]
            cat_ref[:, (k + dy) * W:(k + dy + 1) * W] = mcan_ref[r0:r0 + H, :]

        acc = jnp.dot(cat_ref[...], m_ref[...],
                      preferred_element_type=jnp.float32)
        o_ref[0, 0] = jax.nn.sigmoid(acc).astype(o_ref.dtype)


def _conv_matrices(w, k, pad, W, C):
    """Build the (2*k*W, W) stacked banded Toeplitz matrices from (1,2,k,k) w.

    For channel c (avg, max) and H-tap dy, the (W, W) band M[c, dy] satisfies
        (rows @ M[c, dy])[y, x] == sum_dx w[c, dy, dx] * rows[y, x + dx - pad]
    with W-direction zero padding folded in.  Avg-channel bands are pre-scaled
    by 1/C so the kernel can feed the raw channel sum.  The stack is flattened
    in (c, dy, x_src) row order to match the kernel's lane-concatenated operand.
    """
    wj = jnp.asarray(w, jnp.float32).reshape(2, k, k)
    xs = jnp.arange(W)[:, None]        # source column x'
    xo = jnp.arange(W)[None, :]        # output column x
    dx = xs - xo + pad                 # tap index mapping x' -> x
    valid = (dx >= 0) & (dx < k)
    dxc = jnp.clip(dx, 0, k - 1)
    m = jnp.where(valid[None, None, :, :], wj[:, :, dxc], 0.0)   # (2,k,W,W)
    m = m.at[0].multiply(1.0 / C)
    return m.reshape(2 * k * W, W)


def _vmem_capacity_bytes():
    """Per-core VMEM capacity; conservative 64 MiB (v7x physical) fallback."""
    try:
        info = pltpu.get_tpu_info()
        for attr in ("vmem_capacity_bytes", "vmem_bytes", "vmem_size_bytes"):
            v = getattr(info, attr, None)
            if v:
                return int(v)
    except Exception:
        pass
    return 64 << 20


def _pick_channel_tile(C, tc_budget):
    """Largest channel tile that divides C and fits the VMEM budget."""
    tc_budget = int(max(1, min(C, tc_budget)))
    if C <= tc_budget:
        return C                                   # whole reduction in one step
    best = 0
    d = 8
    while d <= tc_budget:                          # prefer 8-aligned divisors
        if C % d == 0:
            best = d
        d += 8
    if best:
        return best
    best = 1
    for d in range(2, tc_budget + 1):              # fallback: any divisor
        if C % d == 0:
            best = d
    return best


def spatial_attention(x, w, kernel_size=7, max_channel_tile=None):
    """Pallas forward pass of SpatialAttention.

    x: (B, C, H, W) float array (f32 or bf16); w: (1, 2, k, k) conv weight.
    Returns sigmoid(conv2d(cat([mean_c(x), max_c(x)], 1), w)), shape
    (B, 1, H, W), dtype x.dtype.
    """
    assert kernel_size in (3, 7), "kernel size must be 3 or 7"
    B, C, H, W = x.shape
    k = kernel_size
    pad = k // 2
    HW = H * W
    HP = H + 16                        # canvas rows: interior at [8, 8 + H)

    rup = lambda n, m: -(-n // m) * m
    itemsize = jnp.dtype(x.dtype).itemsize

    # ---- VMEM budget -> channel tile size -----------------------------------
    vmem_cap = _vmem_capacity_bytes()
    budget = int(vmem_cap * 0.7)       # leave headroom for compiler/pipelining
    fixed = (2 * rup(2 * k * W, 8) * rup(W, 128) * 4    # m, double-buffered
             + 2 * rup(H, 8) * rup(W, 128) * 4          # output block, dbl-buf
             + 2 * 8 * rup(HW, 128) * 4                 # flat sum/max scratch
             + 2 * rup(HP, 8) * rup(W, 128) * 4         # canvases
             + rup(H, 8) * rup(2 * k * W, 128) * 4)     # cat operand
    per_chan = 2 * rup(HW, 128) * itemsize              # input, double-buffered
    tc_budget = max(1, (budget - fixed) // per_chan)
    if max_channel_tile is not None:
        tc_budget = min(tc_budget, max_channel_tile)
    TC = _pick_channel_tile(C, tc_budget)
    nct = C // TC

    m = _conv_matrices(w, k, pad, W, C)
    x_flat = x.reshape(B, C, HW)       # lane-dense view, free for contig NCHW
    kern = functools.partial(_sa_kernel, H=H, W=W, n_ct=nct, k=k, pad=pad)

    cost = pl.CostEstimate(
        flops=int(2 * B * HW * (C + 2 * k * W)),
        transcendentals=int(B * HW),
        bytes_accessed=int(x.size * itemsize + m.size * 4 + B * HW * itemsize),
    )

    out = pl.pallas_call(
        kern,
        grid=(B, nct),
        in_specs=[
            pl.BlockSpec((1, TC, HW), lambda b, ct: (b, ct, 0)),
            pl.BlockSpec((2 * k * W, W), lambda b, ct: (0, 0)),
        ],
        out_specs=pl.BlockSpec((1, 1, H, W), lambda b, ct: (b, 0, 0, 0)),
        out_shape=jax.ShapeDtypeStruct((B, 1, H, W), x.dtype),
        scratch_shapes=[
            pltpu.VMEM((1, HW), jnp.float32),          # running channel sum
            pltpu.VMEM((1, HW), jnp.float32),          # running channel max
            pltpu.VMEM((HP, W), jnp.float32),          # sum canvas (0 borders)
            pltpu.VMEM((HP, W), jnp.float32),          # max canvas (0 borders)
            pltpu.VMEM((H, 2 * k * W), jnp.float32),   # conv operand
        ],
        compiler_params=pltpu.CompilerParams(
            # Batch axis parallel (megacore on v7x); channel-tile axis is a
            # sequential reduction with scratch accumulators -> "arbitrary".
            dimension_semantics=("parallel", "arbitrary"),
            vmem_limit_bytes=int(min(vmem_cap * 0.9, 128 * 1024 * 1024)),
        ),
        cost_estimate=cost,
    )(x_flat, m)
    return out


def reference(x, w, kernel_size):
    """Pure-JAX reference matching the PyTorch module (f32 math)."""
    pad = kernel_size // 2
    xf = x.astype(jnp.float32)
    avg = jnp.mean(xf, axis=1, keepdims=True)
    mx = jnp.max(xf, axis=1, keepdims=True)
    xin = jnp.concatenate([avg, mx], axis=1)            # (B, 2, H, W)
    out = jax.lax.conv_general_dilated(
        xin, jnp.asarray(w, jnp.float32), window_strides=(1, 1),
        padding=((pad, pad), (pad, pad)),
        dimension_numbers=("NCHW", "OIHW", "NCHW"))
    return jax.nn.sigmoid(out)


if __name__ == "__main__":
    key = jax.random.PRNGKey(0)

    configs = [
        # (shape, kernel_size, dtype, forced max channel tile)
        ((2, 32, 16, 16), 7, jnp.float32, None),   # VMEM-sized tile (single step)
        ((2, 32, 16, 16), 7, jnp.float32, 8),      # forced multi-tile reduction
        ((2, 4, 16, 16), 3, jnp.float32, None),    # kernel_size=3
        ((2, 32, 16, 16), 7, jnp.bfloat16, None),  # bf16 input (half HBM bytes)
    ]

    for shape, k, dtype, max_tc in configs:
        key, kx, kw = jax.random.split(key, 3)
        x = jax.random.normal(kx, shape, jnp.float32)
        bound = 1.0 / math.sqrt(2 * k * k)          # PyTorch conv init scale
        w = jax.random.uniform(kw, (1, 2, k, k), jnp.float32, -bound, bound)
        x = x.astype(dtype)

        out = spatial_attention(x, w, kernel_size=k, max_channel_tile=max_tc)
        out = jax.block_until_ready(out)

        ref = reference(x, w, k)
        tol = (dict(rtol=1e-4, atol=2e-5) if dtype == jnp.float32
               else dict(rtol=2e-2, atol=4e-3))
        np.testing.assert_allclose(np.asarray(out, np.float32),
                                   np.asarray(ref, np.float32), **tol)
        assert out.shape == (shape[0], 1, shape[2], shape[3])
        assert out.dtype == dtype

    print("KERNEL_OK")
</pallas_src>

<mosaic_0001>
module attributes {stable_mosaic.version = 11 : i64} {
  func.func @_sa_kernel(%arg0: i32, %arg1: i32, %arg2: memref<1x32x256xf32, #tpu.memory_space<vmem>>, %arg3: memref<224x16xf32, #tpu.memory_space<vmem>>, %arg4: memref<1x1x16x16xf32, #tpu.memory_space<vmem>>, %arg5: memref<1x256xf32, #tpu.memory_space<vmem>>, %arg6: memref<1x256xf32, #tpu.memory_space<vmem>>, %arg7: memref<32x16xf32, #tpu.memory_space<vmem>>, %arg8: memref<32x16xf32, #tpu.memory_space<vmem>>, %arg9: memref<16x224xf32, #tpu.memory_space<vmem>>) attributes {dimension_semantics = [#tpu.dimension_semantics<parallel>, #tpu.dimension_semantics<arbitrary>], iteration_bounds = array<i64: 2, 1>, scalar_prefetch = 0 : i64, scratch_operands = 5 : i64, tpu.core_type = #tpu.core_type<tc>, window_params = [{transform_indices = @transform_0, window_bounds = array<i64: 1, 32, 256>}, {pipeline_mode = #tpu.pipeline_mode<synchronous>, transform_indices = @transform_1, window_bounds = array<i64: 224, 16>}, {transform_indices = @transform_2, window_bounds = array<i64: 1, 1, 16, 16>}]} {
    %c0_i32 = arith.constant 0 : i32
    %0 = arith.cmpi eq, %arg1, %c0_i32 : i32
    %1 = arith.extui %0 : i1 to i32
    %c0_i32_0 = arith.constant 0 : i32
    %2 = arith.cmpi ne, %1, %c0_i32_0 : i32
    scf.if %2 {
      %cst_14 = arith.constant 0.000000e+00 : f32
      %18 = vector.broadcast %cst_14 : f32 to vector<1x256xf32>
      %c0_15 = arith.constant 0 : index
      %c0_16 = arith.constant 0 : index
      %19 = vector.load %arg5[%c0_15, %c0_16] : memref<1x256xf32, #tpu.memory_space<vmem>>, vector<1x256xf32>
      tpu.vector_store %arg5[%c0_15, %c0_16], %18 {strides = array<i32>} : memref<1x256xf32, #tpu.memory_space<vmem>>, vector<1x256xf32>,
      %cst_17 = arith.constant 0xFF800000 : f32
      %20 = vector.broadcast %cst_17 : f32 to vector<1x256xf32>
      %c0_18 = arith.constant 0 : index
      %c0_19 = arith.constant 0 : index
      %21 = vector.load %arg6[%c0_18, %c0_19] : memref<1x256xf32, #tpu.memory_space<vmem>>, vector<1x256xf32>
      tpu.vector_store %arg6[%c0_18, %c0_19], %20 {strides = array<i32>} : memref<1x256xf32, #tpu.memory_space<vmem>>, vector<1x256xf32>,
    } else {
    }
    %c0 = arith.constant 0 : index
    %c0_1 = arith.constant 0 : index
    %c0_2 = arith.constant 0 : index
    %3 = vector.load %arg2[%c0, %c0_1, %c0_2] : memref<1x32x256xf32, #tpu.memory_space<vmem>>, vector<1x32x256xf32>
    %4 = vector.shape_cast %3 : vector<1x32x256xf32> to vector<32x256xf32>
    %c0_3 = arith.constant 0 : index
    %c0_4 = arith.constant 0 : index
    %5 = vector.load %arg5[%c0_3, %c0_4] : memref<1x256xf32, #tpu.memory_space<vmem>>, vector<1x256xf32>
    %cst = arith.constant dense<0.000000e+00> : vector<256xf32>
    %6 = vector.multi_reduction <add>, %4, %cst [0] : vector<32x256xf32> to vector<256xf32>
    %7 = vector.shape_cast %6 : vector<256xf32> to vector<1x256xf32>
    %8 = arith.addf %5, %7 : vector<1x256xf32>
    %c0_5 = arith.constant 0 : index
    %c0_6 = arith.constant 0 : index
    %9 = vector.load %arg5[%c0_5, %c0_6] : memref<1x256xf32, #tpu.memory_space<vmem>>, vector<1x256xf32>
    tpu.vector_store %arg5[%c0_5, %c0_6], %8 {strides = array<i32>} : memref<1x256xf32, #tpu.memory_space<vmem>>, vector<1x256xf32>,
    %c0_7 = arith.constant 0 : index
    %c0_8 = arith.constant 0 : index
    %10 = vector.load %arg6[%c0_7, %c0_8] : memref<1x256xf32, #tpu.memory_space<vmem>>, vector<1x256xf32>
    %cst_9 = arith.constant dense<0xFF800000> : vector<256xf32>
    %11 = vector.multi_reduction <maximumf>, %4, %cst_9 [0] : vector<32x256xf32> to vector<256xf32>
    %12 = vector.shape_cast %11 : vector<256xf32> to vector<1x256xf32>
    %13 = arith.maximumf %10, %12 : vector<1x256xf32>
    %c0_10 = arith.constant 0 : index
    %c0_11 = arith.constant 0 : index
    %14 = vector.load %arg6[%c0_10, %c0_11] : memref<1x256xf32, #tpu.memory_space<vmem>>, vector<1x256xf32>
    tpu.vector_store %arg6[%c0_10, %c0_11], %13 {strides = array<i32>} : memref<1x256xf32, #tpu.memory_space<vmem>>, vector<1x256xf32>,
    %c0_i32_12 = arith.constant 0 : i32
    %15 = arith.cmpi eq, %arg1, %c0_i32_12 : i32
    %16 = arith.extui %15 : i1 to i32
    %c0_i32_13 = arith.constant 0 : i32
    %17 = arith.cmpi ne, %16, %c0_i32_13 : i32
    scf.if %17 {
      %cst_14 = arith.constant 0.000000e+00 : f32
      %18 = vector.broadcast %cst_14 : f32 to vector<32x16xf32>
      %c0_15 = arith.constant 0 : index
      %c0_16 = arith.constant 0 : index
      %19 = vector.load %arg7[%c0_15, %c0_16] : memref<32x16xf32, #tpu.memory_space<vmem>>, vector<32x16xf32>
      tpu.vector_store %arg7[%c0_15, %c0_16], %18 {strides = array<i32>} : memref<32x16xf32, #tpu.memory_space<vmem>>, vector<32x16xf32>,
      %cst_17 = arith.constant 0.000000e+00 : f32
      %20 = vector.broadcast %cst_17 : f32 to vector<32x16xf32>
      %c0_18 = arith.constant 0 : index
      %c0_19 = arith.constant 0 : index
      %21 = vector.load %arg8[%c0_18, %c0_19] : memref<32x16xf32, #tpu.memory_space<vmem>>, vector<32x16xf32>
      tpu.vector_store %arg8[%c0_18, %c0_19], %20 {strides = array<i32>} : memref<32x16xf32, #tpu.memory_space<vmem>>, vector<32x16xf32>,
      %c0_20 = arith.constant 0 : index
      %c0_21 = arith.constant 0 : index
      %22 = vector.load %arg5[%c0_20, %c0_21] : memref<1x256xf32, #tpu.memory_space<vmem>>, vector<1x16xf32>
      %c8 = arith.constant 8 : index
      %c0_22 = arith.constant 0 : index
      %23 = vector.load %arg7[%c8, %c0_22] : memref<32x16xf32, #tpu.memory_space<vmem>>, vector<1x16xf32>
      tpu.vector_store %arg7[%c8, %c0_22], %22 {strides = array<i32>} : memref<32x16xf32, #tpu.memory_space<vmem>>, vector<1x16xf32>,
      %c0_23 = arith.constant 0 : index
      %c0_24 = arith.constant 0 : index
      %24 = vector.load %arg6[%c0_23, %c0_24] : memref<1x256xf32, #tpu.memory_space<vmem>>, vector<1x16xf32>
      %c8_25 = arith.constant 8 : index
      %c0_26 = arith.constant 0 : index
      %25 = vector.load %arg8[%c8_25, %c0_26] : memref<32x16xf32, #tpu.memory_space<vmem>>, vector<1x16xf32>
      tpu.vector_store %arg8[%c8_25, %c0_26], %24 {strides = array<i32>} : memref<32x16xf32, #tpu.memory_space<vmem>>, vector<1x16xf32>,
      %c0_27 = arith.constant 0 : index
      %c16 = arith.constant 16 : index
      %26 = vector.load %arg5[%c0_27, %c16] : memref<1x256xf32, #tpu.memory_space<vmem>>, vector<1x16xf32>
      %c9 = arith.constant 9 : index
      %c0_28 = arith.constant 0 : index
      %27 = vector.load %arg7[%c9, %c0_28] : memref<32x16xf32, #tpu.memory_space<vmem>>, vector<1x16xf32>
      tpu.vector_store %arg7[%c9, %c0_28], %26 {strides = array<i32>} : memref<32x16xf32, #tpu.memory_space<vmem>>, vector<1x16xf32>,
      %c0_29 = arith.constant 0 : index
      %c16_30 = arith.constant 16 : index
      %28 = vector.load %arg6[%c0_29, %c16_30] : memref<1x256xf32, #tpu.memory_space<vmem>>, vector<1x16xf32>
      %c9_31 = arith.constant 9 : index
      %c0_32 = arith.constant 0 : index
      %29 = vector.load %arg8[%c9_31, %c0_32] : memref<32x16xf32, #tpu.memory_space<vmem>>, vector<1x16xf32>
      tpu.vector_store %arg8[%c9_31, %c0_32], %28 {strides = array<i32>} : memref<32x16xf32, #tpu.memory_space<vmem>>, vector<1x16xf32>,
      %c0_33 = arith.constant 0 : index
      %c32 = arith.constant 32 : index
      %30 = vector.load %arg5[%c0_33, %c32] : memref<1x256xf32, #tpu.memory_space<vmem>>, vector<1x16xf32>
      %c10 = arith.constant 10 : index
      %c0_34 = arith.constant 0 : index
      %31 = vector.load %arg7[%c10, %c0_34] : memref<32x16xf32, #tpu.memory_space<vmem>>, vector<1x16xf32>
      tpu.vector_store %arg7[%c10, %c0_34], %30 {strides = array<i32>} : memref<32x16xf32, #tpu.memory_space<vmem>>, vector<1x16xf32>,
      %c0_35 = arith.constant 0 : index
      %c32_36 = arith.constant 32 : index
      %32 = vector.load %arg6[%c0_35, %c32_36] : memref<1x256xf32, #tpu.memory_space<vmem>>, vector<1x16xf32>
      %c10_37 = arith.constant 10 : index
      %c0_38 = arith.constant 0 : index
      %33 = vector.load %arg8[%c10_37, %c0_38] : memref<32x16xf32, #tpu.memory_space<vmem>>, vector<1x16xf32>
      tpu.vector_store %arg8[%c10_37, %c0_38], %32 {strides = array<i32>} : memref<32x16xf32, #tpu.memory_space<vmem>>, vector<1x16xf32>,
      %c0_39 = arith.constant 0 : index
      %c48 = arith.constant 48 : index
      %34 = vector.load %arg5[%c0_39, %c48] : memref<1x256xf32, #tpu.memory_space<vmem>>, vector<1x16xf32>
      %c11 = arith.constant 11 : index
      %c0_40 = arith.constant 0 : index
      %35 = vector.load %arg7[%c11, %c0_40] : memref<32x16xf32, #tpu.memory_space<vmem>>, vector<1x16xf32>
      tpu.vector_store %arg7[%c11, %c0_40], %34 {strides = array<i32>} : memref<32x16xf32, #tpu.memory_space<vmem>>, vector<1x16xf32>,
      %c0_41 = arith.constant 0 : index
      %c48_42 = arith.constant 48 : index
      %36 = vector.load %arg6[%c0_41, %c48_42] : memref<1x256xf32, #tpu.memory_space<vmem>>, vector<1x16xf32>
      %c11_43 = arith.constant 11 : index
      %c0_44 = arith.constant 0 : index
      %37 = vector.load %arg8[%c11_43, %c0_44] : memref<32x16xf32, #tpu.memory_space<vmem>>, vector<1x16xf32>
      tpu.vector_store %arg8[%c11_43, %c0_44], %36 {strides = array<i32>} : memref<32x16xf32, #tpu.memory_space<vmem>>, vector<1x16xf32>,
      %c0_45 = arith.constant 0 : index
      %c64 = arith.constant 64 : index
      %38 = vector.load %arg5[%c0_45, %c64] : memref<1x256xf32, #tpu.memory_space<vmem>>, vector<1x16xf32>
      %c12 = arith.constant 12 : index
      %c0_46 = arith.constant 0 : index
      %39 = vector.load %arg7[%c12, %c0_46] : memref<32x16xf32, #tpu.memory_space<vmem>>, vector<1x16xf32>
      tpu.vector_store %arg7[%c12, %c0_46], %38 {strides = array<i32>} : memref<32x16xf32, #tpu.memory_space<vmem>>, vector<1x16xf32>,
      %c0_47 = arith.constant 0 : index
      %c64_48 = arith.constant 64 : index
      %40 = vector.load %arg6[%c0_47, %c64_48] : memref<1x256xf32, #tpu.memory_space<vmem>>, vector<1x16xf32>
      %c12_49 = arith.constant 12 : index
      %c0_50 = arith.constant 0 : index
      %41 = vector.load %arg8[%c12_49, %c0_50] : memref<32x16xf32, #tpu.memory_space<vmem>>, vector<1x16xf32>
      tpu.vector_store %arg8[%c12_49, %c0_50], %40 {strides = array<i32>} : memref<32x16xf32, #tpu.memory_space<vmem>>, vector<1x16xf32>,
      %c0_51 = arith.constant 0 : index
      %c80 = arith.constant 80 : index
      %42 = vector.load %arg5[%c0_51, %c80] : memref<1x256xf32, #tpu.memory_space<vmem>>, vector<1x16xf32>
      %c13 = arith.constant 13 : index
      %c0_52 = arith.constant 0 : index
      %43 = vector.load %arg7[%c13, %c0_52] : memref<32x16xf32, #tpu.memory_space<vmem>>, vector<1x16xf32>
      tpu.vector_store %arg7[%c13, %c0_52], %42 {strides = array<i32>} : memref<32x16xf32, #tpu.memory_space<vmem>>, vector<1x16xf32>,
      %c0_53 = arith.constant 0 : index
      %c80_54 = arith.constant 80 : index
      %44 = vector.load %arg6[%c0_53, %c80_54] : memref<1x256xf32, #tpu.memory_space<vmem>>, vector<1x16xf32>
      %c13_55 = arith.constant 13 : index
      %c0_56 = arith.constant 0 : index
      %45 = vector.load %arg8[%c13_55, %c0_56] : memref<32x16xf32, #tpu.memory_space<vmem>>, vector<1x16xf32>
      tpu.vector_store %arg8[%c13_55, %c0_56], %44 {strides = array<i32>} : memref<32x16xf32, #tpu.memory_space<vmem>>, vector<1x16xf32>,
      %c0_57 = arith.constant 0 : index
      %c96 = arith.constant 96 : index
      %46 = vector.load %arg5[%c0_57, %c96] : memref<1x256xf32, #tpu.memory_space<vmem>>, vector<1x16xf32>
      %c14 = arith.constant 14 : index
      %c0_58 = arith.constant 0 : index
      %47 = vector.load %arg7[%c14, %c0_58] : memref<32x16xf32, #tpu.memory_space<vmem>>, vector<1x16xf32>
      tpu.vector_store %arg7[%c14, %c0_58], %46 {strides = array<i32>} : memref<32x16xf32, #tpu.memory_space<vmem>>, vector<1x16xf32>,
      %c0_59 = arith.constant 0 : index
      %c96_60 = arith.constant 96 : index
      %48 = vector.load %arg6[%c0_59, %c96_60] : memref<1x256xf32, #tpu.memory_space<vmem>>, vector<1x16xf32>
      %c14_61 = arith.constant 14 : index
      %c0_62 = arith.constant 0 : index
      %49 = vector.load %arg8[%c14_61, %c0_62] : memref<32x16xf32, #tpu.memory_space<vmem>>, vector<1x16xf32>
      tpu.vector_store %arg8[%c14_61, %c0_62], %48 {strides = array<i32>} : memref<32x16xf32, #tpu.memory_space<vmem>>, vector<1x16xf32>,
      %c0_63 = arith.constant 0 : index
      %c112 = arith.constant 112 : index
      %50 = vector.load %arg5[%c0_63, %c112] : memref<1x256xf32, #tpu.memory_space<vmem>>, vector<1x16xf32>
      %c15 = arith.constant 15 : index
      %c0_64 = arith.constant 0 : index
      %51 = vector.load %arg7[%c15, %c0_64] : memref<32x16xf32, #tpu.memory_space<vmem>>, vector<1x16xf32>
      tpu.vector_store %arg7[%c15, %c0_64], %50 {strides = array<i32>} : memref<32x16xf32, #tpu.memory_space<vmem>>, vector<1x16xf32>,
      %c0_65 = arith.constant 0 : index
      %c112_66 = arith.constant 112 : index
      %52 = vector.load %arg6[%c0_65, %c112_66] : memref<1x256xf32, #tpu.memory_space<vmem>>, vector<1x16xf32>
      %c15_67 = arith.constant 15 : index
      %c0_68 = arith.constant 0 : index
      %53 = vector.load %arg8[%c15_67, %c0_68] : memref<32x16xf32, #tpu.memory_space<vmem>>, vector<1x16xf32>
      tpu.vector_store %arg8[%c15_67, %c0_68], %52 {strides = array<i32>} : memref<32x16xf32, #tpu.memory_space<vmem>>, vector<1x16xf32>,
      %c0_69 = arith.constant 0 : index
      %c128 = arith.constant 128 : index
      %54 = vector.load %arg5[%c0_69, %c128] : memref<1x256xf32, #tpu.memory_space<vmem>>, vector<1x16xf32>
      %c16_70 = arith.constant 16 : index
      %c0_71 = arith.constant 0 : index
      %55 = vector.load %arg7[%c16_70, %c0_71] : memref<32x16xf32, #tpu.memory_space<vmem>>, vector<1x16xf32>
      tpu.vector_store %arg7[%c16_70, %c0_71], %54 {strides = array<i32>} : memref<32x16xf32, #tpu.memory_space<vmem>>, vector<1x16xf32>,
      %c0_72 = arith.constant 0 : index
      %c128_73 = arith.constant 128 : index
      %56 = vector.load %arg6[%c0_72, %c128_73] : memref<1x256xf32, #tpu.memory_space<vmem>>, vector<1x16xf32>
      %c16_74 = arith.constant 16 : index
      %c0_75 = arith.constant 0 : index
      %57 = vector.load %arg8[%c16_74, %c0_75] : memref<32x16xf32, #tpu.memory_space<vmem>>, vector<1x16xf32>
      tpu.vector_store %arg8[%c16_74, %c0_75], %56 {strides = array<i32>} : memref<32x16xf32, #tpu.memory_space<vmem>>, vector<1x16xf32>,
      %c0_76 = arith.constant 0 : index
      %c144 = arith.constant 144 : index
      %58 = vector.load %arg5[%c0_76, %c144] : memref<1x256xf32, #tpu.memory_space<vmem>>, vector<1x16xf32>
      %c17 = arith.constant 17 : index
      %c0_77 = arith.constant 0 : index
      %59 = vector.load %arg7[%c17, %c0_77] : memref<32x16xf32, #tpu.memory_space<vmem>>, vector<1x16xf32>
      tpu.vector_store %arg7[%c17, %c0_77], %58 {strides = array<i32>} : memref<32x16xf32, #tpu.memory_space<vmem>>, vector<1x16xf32>,
      %c0_78 = arith.constant 0 : index
      %c144_79 = arith.constant 144 : index
      %60 = vector.load %arg6[%c0_78, %c144_79] : memref<1x256xf32, #tpu.memory_space<vmem>>, vector<1x16xf32>
      %c17_80 = arith.constant 17 : index
      %c0_81 = arith.constant 0 : index
      %61 = vector.load %arg8[%c17_80, %c0_81] : memref<32x16xf32, #tpu.memory_space<vmem>>, vector<1x16xf32>
      tpu.vector_store %arg8[%c17_80, %c0_81], %60 {strides = array<i32>} : memref<32x16xf32, #tpu.memory_space<vmem>>, vector<1x16xf32>,
      %c0_82 = arith.constant 0 : index
      %c160 = arith.constant 160 : index
      %62 = vector.load %arg5[%c0_82, %c160] : memref<1x256xf32, #tpu.memory_space<vmem>>, vector<1x16xf32>
      %c18 = arith.constant 18 : index
      %c0_83 = arith.constant 0 : index
      %63 = vector.load %arg7[%c18, %c0_83] : memref<32x16xf32, #tpu.memory_space<vmem>>, vector<1x16xf32>
      tpu.vector_store %arg7[%c18, %c0_83], %62 {strides = array<i32>} : memref<32x16xf32, #tpu.memory_space<vmem>>, vector<1x16xf32>,
      %c0_84 = arith.constant 0 : index
      %c160_85 = arith.constant 160 : index
      %64 = vector.load %arg6[%c0_84, %c160_85] : memref<1x256xf32, #tpu.memory_space<vmem>>, vector<1x16xf32>
      %c18_86 = arith.constant 18 : index
      %c0_87 = arith.constant 0 : index
      %65 = vector.load %arg8[%c18_86, %c0_87] : memref<32x16xf32, #tpu.memory_space<vmem>>, vector<1x16xf32>
      tpu.vector_store %arg8[%c18_86, %c0_87], %64 {strides = array<i32>} : memref<32x16xf32, #tpu.memory_space<vmem>>, vector<1x16xf32>,
      %c0_88 = arith.constant 0 : index
      %c176 = arith.constant 176 : index
      %66 = vector.load %arg5[%c0_88, %c176] : memref<1x256xf32, #tpu.memory_space<vmem>>, vector<1x16xf32>
      %c19 = arith.constant 19 : index
      %c0_89 = arith.constant 0 : index
      %67 = vector.load %arg7[%c19, %c0_89] : memref<32x16xf32, #tpu.memory_space<vmem>>, vector<1x16xf32>
      tpu.vector_store %arg7[%c19, %c0_89], %66 {strides = array<i32>} : memref<32x16xf32, #tpu.memory_space<vmem>>, vector<1x16xf32>,
      %c0_90 = arith.constant 0 : index
      %c176_91 = arith.constant 176 : index
      %68 = vector.load %arg6[%c0_90, %c176_91] : memref<1x256xf32, #tpu.memory_space<vmem>>, vector<1x16xf32>
      %c19_92 = arith.constant 19 : index
      %c0_93 = arith.constant 0 : index
      %69 = vector.load %arg8[%c19_92, %c0_93] : memref<32x16xf32, #tpu.memory_space<vmem>>, vector<1x16xf32>
      tpu.vector_store %arg8[%c19_92, %c0_93], %68 {strides = array<i32>} : memref<32x16xf32, #tpu.memory_space<vmem>>, vector<1x16xf32>,
      %c0_94 = arith.constant 0 : index
      %c192 = arith.constant 192 : index
      %70 = vector.load %arg5[%c0_94, %c192] : memref<1x256xf32, #tpu.memory_space<vmem>>, vector<1x16xf32>
      %c20 = arith.constant 20 : index
      %c0_95 = arith.constant 0 : index
      %71 = vector.load %arg7[%c20, %c0_95] : memref<32x16xf32, #tpu.memory_space<vmem>>, vector<1x16xf32>
      tpu.vector_store %arg7[%c20, %c0_95], %70 {strides = array<i32>} : memref<32x16xf32, #tpu.memory_space<vmem>>, vector<1x16xf32>,
      %c0_96 = arith.constant 0 : index
      %c192_97 = arith.constant 192 : index
      %72 = vector.load %arg6[%c0_96, %c192_97] : memref<1x256xf32, #tpu.memory_space<vmem>>, vector<1x16xf32>
      %c20_98 = arith.constant 20 : index
      %c0_99 = arith.constant 0 : index
      %73 = vector.load %arg8[%c20_98, %c0_99] : memref<32x16xf32, #tpu.memory_space<vmem>>, vector<1x16xf32>
      tpu.vector_store %arg8[%c20_98, %c0_99], %72 {strides = array<i32>} : memref<32x16xf32, #tpu.memory_space<vmem>>, vector<1x16xf32>,
      %c0_100 = arith.constant 0 : index
      %c208 = arith.constant 208 : index
      %74 = vector.load %arg5[%c0_100, %c208] : memref<1x256xf32, #tpu.memory_space<vmem>>, vector<1x16xf32>
      %c21 = arith.constant 21 : index
      %c0_101 = arith.constant 0 : index
      %75 = vector.load %arg7[%c21, %c0_101] : memref<32x16xf32, #tpu.memory_space<vmem>>, vector<1x16xf32>
      tpu.vector_store %arg7[%c21, %c0_101], %74 {strides = array<i32>} : memref<32x16xf32, #tpu.memory_space<vmem>>, vector<1x16xf32>,
      %c0_102 = arith.constant 0 : index
      %c208_103 = arith.constant 208 : index
      %76 = vector.load %arg6[%c0_102, %c208_103] : memref<1x256xf32, #tpu.memory_space<vmem>>, vector<1x16xf32>
      %c21_104 = arith.constant 21 : index
      %c0_105 = arith.constant 0 : index
      %77 = vector.load %arg8[%c21_104, %c0_105] : memref<32x16xf32, #tpu.memory_space<vmem>>, vector<1x16xf32>
      tpu.vector_store %arg8[%c21_104, %c0_105], %76 {strides = array<i32>} : memref<32x16xf32, #tpu.memory_space<vmem>>, vector<1x16xf32>,
      %c0_106 = arith.constant 0 : index
      %c224 = arith.constant 224 : index
      %78 = vector.load %arg5[%c0_106, %c224] : memref<1x256xf32, #tpu.memory_space<vmem>>, vector<1x16xf32>
      %c22 = arith.constant 22 : index
      %c0_107 = arith.constant 0 : index
      %79 = vector.load %arg7[%c22, %c0_107] : memref<32x16xf32, #tpu.memory_space<vmem>>, vector<1x16xf32>
      tpu.vector_store %arg7[%c22, %c0_107], %78 {strides = array<i32>} : memref<32x16xf32, #tpu.memory_space<vmem>>, vector<1x16xf32>,
      %c0_108 = arith.constant 0 : index
      %c224_109 = arith.constant 224 : index
      %80 = vector.load %arg6[%c0_108, %c224_109] : memref<1x256xf32, #tpu.memory_space<vmem>>, vector<1x16xf32>
      %c22_110 = arith.constant 22 : index
      %c0_111 = arith.constant 0 : index
      %81 = vector.load %arg8[%c22_110, %c0_111] : memref<32x16xf32, #tpu.memory_space<vmem>>, vector<1x16xf32>
      tpu.vector_store %arg8[%c22_110, %c0_111], %80 {strides = array<i32>} : memref<32x16xf32, #tpu.memory_space<vmem>>, vector<1x16xf32>,
      %c0_112 = arith.constant 0 : index
      %c240 = arith.constant 240 : index
      %82 = vector.load %arg5[%c0_112, %c240] : memref<1x256xf32, #tpu.memory_space<vmem>>, vector<1x16xf32>
      %c23 = arith.constant 23 : index
      %c0_113 = arith.constant 0 : index
      %83 = vector.load %arg7[%c23, %c0_113] : memref<32x16xf32, #tpu.memory_space<vmem>>, vector<1x16xf32>
      tpu.vector_store %arg7[%c23, %c0_113], %82 {strides = array<i32>} : memref<32x16xf32, #tpu.memory_space<vmem>>, vector<1x16xf32>,
      %c0_114 = arith.constant 0 : index
      %c240_115 = arith.constant 240 : index
      %84 = vector.load %arg6[%c0_114, %c240_115] : memref<1x256xf32, #tpu.memory_space<vmem>>, vector<1x16xf32>
      %c23_116 = arith.constant 23 : index
      %c0_117 = arith.constant 0 : index
      %85 = vector.load %arg8[%c23_116, %c0_117] : memref<32x16xf32, #tpu.memory_space<vmem>>, vector<1x16xf32>
      tpu.vector_store %arg8[%c23_116, %c0_117], %84 {strides = array<i32>} : memref<32x16xf32, #tpu.memory_space<vmem>>, vector<1x16xf32>,
      %c5 = arith.constant 5 : index
      %c0_118 = arith.constant 0 : index
      %86 = vector.load %arg7[%c5, %c0_118] : memref<32x16xf32, #tpu.memory_space<vmem>>, vector<16x16xf32>
      %c0_119 = arith.constant 0 : index
      %c0_120 = arith.constant 0 : index
      %87 = vector.load %arg9[%c0_119, %c0_120] : memref<16x224xf32, #tpu.memory_space<vmem>>, vector<16x16xf32>
      tpu.vector_store %arg9[%c0_119, %c0_120], %86 {strides = array<i32>} : memref<16x224xf32, #tpu.memory_space<vmem>>, vector<16x16xf32>,
      %c5_121 = arith.constant 5 : index
      %c0_122 = arith.constant 0 : index
      %88 = vector.load %arg8[%c5_121, %c0_122] : memref<32x16xf32, #tpu.memory_space<vmem>>, vector<16x16xf32>
      %c0_123 = arith.constant 0 : index
      %c112_124 = arith.constant 112 : index
      %89 = vector.load %arg9[%c0_123, %c112_124] : memref<16x224xf32, #tpu.memory_space<vmem>>, vector<16x16xf32>
      tpu.vector_store %arg9[%c0_123, %c112_124], %88 {strides = array<i32>} : memref<16x224xf32, #tpu.memory_space<vmem>>, vector<16x16xf32>,
      %c6 = arith.constant 6 : index
      %c0_125 = arith.constant 0 : index
      %90 = vector.load %arg7[%c6, %c0_125] : memref<32x16xf32, #tpu.memory_space<vmem>>, vector<16x16xf32>
      %c0_126 = arith.constant 0 : index
      %c16_127 = arith.constant 16 : index
      %91 = vector.load %arg9[%c0_126, %c16_127] : memref<16x224xf32, #tpu.memory_space<vmem>>, vector<16x16xf32>
      tpu.vector_store %arg9[%c0_126, %c16_127], %90 {strides = array<i32>} : memref<16x224xf32, #tpu.memory_space<vmem>>, vector<16x16xf32>,
      %c6_128 = arith.constant 6 : index
      %c0_129 = arith.constant 0 : index
      %92 = vector.load %arg8[%c6_128, %c0_129] : memref<32x16xf32, #tpu.memory_space<vmem>>, vector<16x16xf32>
      %c0_130 = arith.constant 0 : index
      %c128_131 = arith.constant 128 : index
      %93 = vector.load %arg9[%c0_130, %c128_131] : memref<16x224xf32, #tpu.memory_space<vmem>>, vector<16x16xf32>
      tpu.vector_store %arg9[%c0_130, %c128_131], %92 {strides = array<i32>} : memref<16x224xf32, #tpu.memory_space<vmem>>, vector<16x16xf32>,
      %c7 = arith.constant 7 : index
      %c0_132 = arith.constant 0 : index
      %94 = vector.load %arg7[%c7, %c0_132] : memref<32x16xf32, #tpu.memory_space<vmem>>, vector<16x16xf32>
      %c0_133 = arith.constant 0 : index
      %c32_134 = arith.constant 32 : index
      %95 = vector.load %arg9[%c0_133, %c32_134] : memref<16x224xf32, #tpu.memory_space<vmem>>, vector<16x16xf32>
      tpu.vector_store %arg9[%c0_133, %c32_134], %94 {strides = array<i32>} : memref<16x224xf32, #tpu.memory_space<vmem>>, vector<16x16xf32>,
      %c7_135 = arith.constant 7 : index
      %c0_136 = arith.constant 0 : index
      %96 = vector.load %arg8[%c7_135, %c0_136] : memref<32x16xf32, #tpu.memory_space<vmem>>, vector<16x16xf32>
      %c0_137 = arith.constant 0 : index
      %c144_138 = arith.constant 144 : index
      %97 = vector.load %arg9[%c0_137, %c144_138] : memref<16x224xf32, #tpu.memory_space<vmem>>, vector<16x16xf32>
      tpu.vector_store %arg9[%c0_137, %c144_138], %96 {strides = array<i32>} : memref<16x224xf32, #tpu.memory_space<vmem>>, vector<16x16xf32>,
      %c8_139 = arith.constant 8 : index
      %c0_140 = arith.constant 0 : index
      %98 = vector.load %arg7[%c8_139, %c0_140] : memref<32x16xf32, #tpu.memory_space<vmem>>, vector<16x16xf32>
      %c0_141 = arith.constant 0 : index
      %c48_142 = arith.constant 48 : index
      %99 = vector.load %arg9[%c0_141, %c48_142] : memref<16x224xf32, #tpu.memory_space<vmem>>, vector<16x16xf32>
      tpu.vector_store %arg9[%c0_141, %c48_142], %98 {strides = array<i32>} : memref<16x224xf32, #tpu.memory_space<vmem>>, vector<16x16xf32>,
      %c8_143 = arith.constant 8 : index
      %c0_144 = arith.constant 0 : index
      %100 = vector.load %arg8[%c8_143, %c0_144] : memref<32x16xf32, #tpu.memory_space<vmem>>, vector<16x16xf32>
      %c0_145 = arith.constant 0 : index
      %c160_146 = arith.constant 160 : index
      %101 = vector.load %arg9[%c0_145, %c160_146] : memref<16x224xf32, #tpu.memory_space<vmem>>, vector<16x16xf32>
      tpu.vector_store %arg9[%c0_145, %c160_146], %100 {strides = array<i32>} : memref<16x224xf32, #tpu.memory_space<vmem>>, vector<16x16xf32>,
      %c9_147 = arith.constant 9 : index
      %c0_148 = arith.constant 0 : index
      %102 = vector.load %arg7[%c9_147, %c0_148] : memref<32x16xf32, #tpu.memory_space<vmem>>, vector<16x16xf32>
      %c0_149 = arith.constant 0 : index
      %c64_150 = arith.constant 64 : index
      %103 = vector.load %arg9[%c0_149, %c64_150] : memref<16x224xf32, #tpu.memory_space<vmem>>, vector<16x16xf32>
      tpu.vector_store %arg9[%c0_149, %c64_150], %102 {strides = array<i32>} : memref<16x224xf32, #tpu.memory_space<vmem>>, vector<16x16xf32>,
      %c9_151 = arith.constant 9 : index
      %c0_152 = arith.constant 0 : index
      %104 = vector.load %arg8[%c9_151, %c0_152] : memref<32x16xf32, #tpu.memory_space<vmem>>, vector<16x16xf32>
      %c0_153 = arith.constant 0 : index
      %c176_154 = arith.constant 176 : index
      %105 = vector.load %arg9[%c0_153, %c176_154] : memref<16x224xf32, #tpu.memory_space<vmem>>, vector<16x16xf32>
      tpu.vector_store %arg9[%c0_153, %c176_154], %104 {strides = array<i32>} : memref<16x224xf32, #tpu.memory_space<vmem>>, vector<16x16xf32>,
      %c10_155 = arith.constant 10 : index
      %c0_156 = arith.constant 0 : index
      %106 = vector.load %arg7[%c10_155, %c0_156] : memref<32x16xf32, #tpu.memory_space<vmem>>, vector<16x16xf32>
      %c0_157 = arith.constant 0 : index
      %c80_158 = arith.constant 80 : index
      %107 = vector.load %arg9[%c0_157, %c80_158] : memref<16x224xf32, #tpu.memory_space<vmem>>, vector<16x16xf32>
      tpu.vector_store %arg9[%c0_157, %c80_158], %106 {strides = array<i32>} : memref<16x224xf32, #tpu.memory_space<vmem>>, vector<16x16xf32>,
      %c10_159 = arith.constant 10 : index
      %c0_160 = arith.constant 0 : index
      %108 = vector.load %arg8[%c10_159, %c0_160] : memref<32x16xf32, #tpu.memory_space<vmem>>, vector<16x16xf32>
      %c0_161 = arith.constant 0 : index
      %c192_162 = arith.constant 192 : index
      %109 = vector.load %arg9[%c0_161, %c192_162] : memref<16x224xf32, #tpu.memory_space<vmem>>, vector<16x16xf32>
      tpu.vector_store %arg9[%c0_161, %c192_162], %108 {strides = array<i32>} : memref<16x224xf32, #tpu.memory_space<vmem>>, vector<16x16xf32>,
      %c11_163 = arith.constant 11 : index
      %c0_164 = arith.constant 0 : index
      %110 = vector.load %arg7[%c11_163, %c0_164] : memref<32x16xf32, #tpu.memory_space<vmem>>, vector<16x16xf32>
      %c0_165 = arith.constant 0 : index
      %c96_166 = arith.constant 96 : index
      %111 = vector.load %arg9[%c0_165, %c96_166] : memref<16x224xf32, #tpu.memory_space<vmem>>, vector<16x16xf32>
      tpu.vector_store %arg9[%c0_165, %c96_166], %110 {strides = array<i32>} : memref<16x224xf32, #tpu.memory_space<vmem>>, vector<16x16xf32>,
      %c11_167 = arith.constant 11 : index
      %c0_168 = arith.constant 0 : index
      %112 = vector.load %arg8[%c11_167, %c0_168] : memref<32x16xf32, #tpu.memory_space<vmem>>, vector<16x16xf32>
      %c0_169 = arith.constant 0 : index
      %c208_170 = arith.constant 208 : index
      %113 = vector.load %arg9[%c0_169, %c208_170] : memref<16x224xf32, #tpu.memory_space<vmem>>, vector<16x16xf32>
      tpu.vector_store %arg9[%c0_169, %c208_170], %112 {strides = array<i32>} : memref<16x224xf32, #tpu.memory_space<vmem>>, vector<16x16xf32>,
      %c0_171 = arith.constant 0 : index
      %c0_172 = arith.constant 0 : index
      %114 = vector.load %arg9[%c0_171, %c0_172] : memref<16x224xf32, #tpu.memory_space<vmem>>, vector<16x224xf32>
      %c0_173 = arith.constant 0 : index
      %c0_174 = arith.constant 0 : index
      %115 = vector.load %arg3[%c0_173, %c0_174] : memref<224x16xf32, #tpu.memory_space<vmem>>, vector<224x16xf32>
      %cst_175 = arith.constant dense<0.000000e+00> : vector<16x16xf32>
      %116 = tpu.matmul %114, %115, %cst_175 {dimension_numbers = #tpu.dot_dimension_numbers<[1], [0], [0], [1], [0, 0, 1, 1], [], []>} : vector<16x224xf32>, vector<224x16xf32>, vector<16x16xf32> -> vector<16x16xf32>
      %117 = arith.negf %116 : vector<16x16xf32>
      %118 = math.exp %117 : vector<16x16xf32>
      %cst_176 = arith.constant 1.000000e+00 : f32
      %119 = vector.broadcast %cst_176 : f32 to vector<16x16xf32>
      %120 = arith.addf %119, %118 : vector<16x16xf32>
      %121 = arith.divf %119, %120 : vector<16x16xf32>
      %c0_177 = arith.constant 0 : index
      %c0_178 = arith.constant 0 : index
      %c0_179 = arith.constant 0 : index
      %c0_180 = arith.constant 0 : index
      %122 = vector.load %arg4[%c0_177, %c0_178, %c0_179, %c0_180] : memref<1x1x16x16xf32, #tpu.memory_space<vmem>>, vector<1x1x16x16xf32>
      %123 = vector.shape_cast %122 : vector<1x1x16x16xf32> to vector<16x16xf32>
      %124 = vector.shape_cast %121 : vector<16x16xf32> to vector<1x1x16x16xf32>
      tpu.vector_store %arg4[%c0_177, %c0_178, %c0_179, %c0_180], %124 {strides = array<i32>} : memref<1x1x16x16xf32, #tpu.memory_space<vmem>>, vector<1x1x16x16xf32>,
    } else {
    }
    return
  }
  func.func @transform_0(%arg0: i32, %arg1: i32) -> (i32, i32, i32) {
    %c0_i32 = arith.constant 0 : i32
    %c0_i32_0 = arith.constant 0 : i32
    return %arg0, %arg1, %c0_i32 : i32, i32, i32
  }
  func.func @transform_1(%arg0: i32, %arg1: i32) -> (i32, i32) {
    %c0_i32 = arith.constant 0 : i32
    %c0_i32_0 = arith.constant 0 : i32
    %c0_i32_1 = arith.constant 0 : i32
    return %c0_i32, %c0_i32_0 : i32, i32
  }
  func.func @transform_2(%arg0: i32, %arg1: i32) -> (i32, i32, i32, i32) {
    %c0_i32 = arith.constant 0 : i32
    %c0_i32_0 = arith.constant 0 : i32
    %c0_i32_1 = arith.constant 0 : i32
    %c0_i32_2 = arith.constant 0 : i32
    return %arg0, %c0_i32, %c0_i32_0, %c0_i32_1 : i32, i32, i32, i32
  }
}

</mosaic_0001>

<bundles_post_ra>
// kernel: tpu_custom_call.1
= control target key start
LH: loop header
LB: loop body
LE: loop exit
PB: predicated region body
PF: predicated region fallthrough
CT: control target
= control target key end

     0   :  { %7 = vsyncpa [#allocation8], 0  ;;  %s1619_s0 = inlined_call_operand.vmem [shape: f32[2,32,256], index: 0, kind: input, shape index: {}]   ;;  %s1620_s1 = inlined_call_operand.vmem [shape: f32[224,16], index: 1, kind: input, shape index: {}]   ;;  %s1621_s2 = inlined_call_operand.hbm [shape: f32[2,1,16,16], index: 2, kind: output, shape index: {}]  }
   0x1   :  { %9 = vsyncpa [#allocation8 + $0x1], 0  ;;  %s1256_s9 = smov 0   ;;  %s1258_s10 = smov 0  }
   0x2   :  { %s1260_s11 = smov 0   ;;  %s1262_s12 = smov 0  }
   0x3   :  { %s1264_s13 = smov 0   ;;  %s1266_s14 = smov 0  }
   0x4 LB: > { %s954_s15 = sadd.s32 4294967295, %s1225_s14   ;;  %s955_s16 = sadd.s32 4294967294, %s1225_s14   ;;  %s1225_s14 = sphi %s1266_s14, %s15_s14   ;;  %s1221_s13 = sphi %s1264_s13, %s1630_s13   ;;  %s1217_s12 = sphi %s1262_s12, %s1629_s12   ;;  %s1213_s11 = sphi %s1260_s11, %s1628_s11   ;;  %s1209_s10 = sphi %s1258_s10, %s1627_s10   ;;  %s1205_s9 = sphi %s1256_s9, %s1626_s9  }
   0x5   : > { %s27_s17 = sadd.s32 1, %s1221_s13  ;;  %s83_s18 = sadd.s32 1, %s1213_s11 }
   0x6   : > { %p29_p0 = scmp.ge.s32.totalorder %s27_s17, 2  ;;  %p93_p1 = scmp.ne.s32.totalorder %s1213_s11, %s1209_s10 }
   0x7   : > { %p94_p2 = scmp.eq.s32.totalorder %s954_s15, 1  ;;  %p99_p3 = scmp.ne.s32.totalorder %s1209_s10, %s1205_s9 }
   0x8   : > { %s1632_s17 = smov (%p29_p0, %s27_s17), 0  ;;  %p100_p5 = scmp.eq.s32.totalorder %s955_s16, 1 }
   0x9   : > { %p1296_p4 = por %p94_p2, %p93_p1  ;;  %s80_s20 = ssub.s32 %s1221_s13, %s1632_s17 }
   0xa   : > { %p958_p6 = scmp.ge.s32.totalorder %s1225_s14, 1  ;;  %p81_p7 = scmp.eq.s32.totalorder %s80_s20, 0 }
   0xb   : > { %p1303_p8 = por %p100_p5, %p99_p3  ;;  %p135_p9 = scmp.lt.s32.totalorder %s1225_s14, 3 }
   0xc   : > { %s1309_s22 = scalar_select %p81_p7, %s1213_s11, %s83_s18  }
   0xd   : > { %p136_p10 = pnand %p958_p6, %p135_p9 }
   0xe   : > { %p163_p11 = scmp.lt.s32.totalorder (!%p136_p10), %s1217_s12, 1  ;;  %v177_v0 = vlaneseq (!%p136_p10)  ;;  %vm276_vm0 = vcmask (!%p136_p10), 130048   ;;  %v1227_v2 = vmov (!%p136_p10), 0.0   ;;  %v1228_v3 = vmov (!%p136_p10), -inf   ;;  %s1230_s28 = smov (!%p136_p10), 80  }
   0xf   : > { %139 = sbr.rel (%p136_p10) target bundleno = 648 (0x288), region = 28  ;;  %282 = vst.msk [vmem:[#allocation5 + $0x8] sm:$0xff] (!%p136_p10), %vm276_vm0, %v1227_v2  ;;  %277 = vst.msk [vmem:[#allocation4] sm:$0xff] (!%p136_p10), %vm276_vm0, %v1227_v2  ;;  %v1229_v28 = vmov (!%p136_p10), 1966171168   ;;  %vm286_vm2 = vcmask (!%p136_p10), 122880  }
  0x10   : > { %vm1313_vm1 = vcmp.lt.s32.totalorder (!%p136_p10), %v177_v0, 256  ;;  %278 = vst.msk [vmem:[#allocation4 + $0x8] sm:$0xff] (!%p136_p10), %vm276_vm0, %v1227_v2  ;;  %279 = vst.msk [vmem:[#allocation4 + $0x10] sm:$0xff] (!%p136_p10), %vm276_vm0, %v1227_v2  ;;  %v214_v29 = vunpack.c.l.s4 (!%p136_p10), %v1229_v28  ;;  %v217_v37 = vshrl.u32 (!%p136_p10), %v177_v0, 7  ;;  %s1231_s29 = smov (!%p136_p10), 112   ;;  %s1232_s30 = smov (!%p136_p10), 64  }
  0x11   : > { %280 = vst.msk [vmem:[#allocation4 + $0x18] sm:$0xff] (!%p136_p10), %vm276_vm0, %v1227_v2  ;;  %281 = vst.msk [vmem:[#allocation5] sm:$0xff] (!%p136_p10), %vm276_vm0, %v1227_v2  ;;  %s1233_s3 = smov (!%p136_p10), 96   ;;  %s1234_s4 = smov (!%p136_p10), 32   ;;  %vm588_vm3 = vcmask (!%p136_p10), 1048448   ;;  %vm601_vm4 = vcmask (!%p136_p10), 261248  }
  0x12   : > { %283 = vst.msk [vmem:[#allocation5 + $0x10] sm:$0xff] (!%p136_p10), %vm276_vm0, %v1227_v2  ;;  %284 = vst.msk [vmem:[#allocation5 + $0x18] sm:$0xff] (!%p136_p10), %vm276_vm0, %v1227_v2  ;;  %v215_v39 = vunpack.c.0.s8 (!%p136_p10), %v214_v29  ;;  %s1235_s5 = smov (!%p136_p10), 48   ;;  %s1236_s6 = smov (!%p136_p10), 16   ;;  %v745_v29 = vld [vmem:[%s1620_s1 + $0x40] sm:$0xff] (!%p136_p10)  ;;  %vm618_vm5 = vcmask (!%p136_p10), 392448  }
  0x13   : > { %182 = vst.msk [vmem:[#allocation3] sm:$0x3] (!%p136_p10), %vm1313_vm1, %v1228_v3  ;;  %181 = vst.msk [vmem:[#allocation2] sm:$0x3] (!%p136_p10), %vm1313_vm1, %v1227_v2  ;;  %vm643_vm6 = vcmask (!%p136_p10), 523648   ;;  %vm668_vm7 = vcmask (!%p136_p10), 654848  }
  0x14   : > { %v218_v48 = vsub.s32 (!%p136_p10), %v215_v39, %v217_v37  ;;  %v748_v37 = vld [vmem:[%s1620_s1 + $0x58] sm:$0xff] (!%p136_p10)  ;;  %vm693_vm8 = vcmask (!%p136_p10), 786048   ;;  %vm765_vm9 = vcmask (!%p136_p10), 785408   ;;  %vm718_vm10 = vcmask (!%p136_p10), 917248  }
  0x16   : > { %s164_s23 = scalar_select %p163_p11, %s1217_s12, 1 }
  0x18   : > { %s999_s24 = sshll.u32 %s164_s23, 6 }
  0x19   : > { %s171_s27 = scalar_lea.vmem %s1619_s0, %s999_s24 }
  0x1a   : > { %v183_v4 = vld [vmem:[%s171_s27] sm:$0xff]  ;;  %v184_v5 = vld [vmem:[%s171_s27 + $0x8] sm:$0xff]  ;;  %v185_v6 = vld [vmem:[%s171_s27 + $0x10] sm:$0xff] }
  0x1b   : > { %v186_v7 = vld [vmem:[%s171_s27 + $0x18] sm:$0xff]  ;;  %v187_v8 = vld [vmem:[%s171_s27 + $0x20] sm:$0xff]  ;;  %v188_v9 = vld [vmem:[%s171_s27 + $0x28] sm:$0xff]  ;;  %v192_v10 = vadd.f32 %v185_v6, %v183_v4 }
  0x1c   : > { %v189_v11 = vld [vmem:[%s171_s27 + $0x30] sm:$0xff]  ;;  %v190_v12 = vld [vmem:[%s171_s27 + $0x38] sm:$0xff]  ;;  %v201_v13 = vadd.f32 %v186_v7, %v184_v5  ;;  %v235_v14 = vmax.f32 %v183_v4, %v187_v8  ;;  %v244_v15 = vmax.f32 %v184_v5, %v188_v9  ;;  %v234_v56 = vld [vmem:[#allocation3] sm:$0x3] }
  0x1d   : > { %v236_v16 = vmax.f32 %v185_v6, %v189_v11  ;;  %v245_v17 = vmax.f32 %v186_v7, %v190_v12  ;;  %v193_v18 = vadd.f32 %v192_v10, %v187_v8  ;;  %v191_v59 = vld [vmem:[#allocation2] sm:$0x3]  ;;  %v738_v8 = vld [vmem:[%s1620_s1 + $0x8] sm:$0xff] }
  0x1e   : > { %v202_v19 = vadd.f32 %v201_v13, %v188_v9  ;;  %v737_v7 = vld [vmem:[%s1620_s1] sm:$0xff]  ;;  %v1237_v9 = vmov 0.0|0.0   ;;  %v739_v13 = vld [vmem:[%s1620_s1 + $0x10] sm:$0xff] }
  0x1f   : > { %v237_v20 = vmax.f32 %v235_v14, %v236_v16  ;;  %v246_v21 = vmax.f32 %v244_v15, %v245_v17  ;;  %v194_v22 = vadd.f32 %v193_v18, %v189_v11  ;;  %1001 = vmatprep.subr.bf16.mxu0 %v1237_v9  ;;  %v1002_v10 = vpack.c.bf16 %v738_v8, %v737_v7  ;;  %v740_v14 = vld [vmem:[%s1620_s1 + $0x18] sm:$0xff]  ;;  %v741_v18 = vld [vmem:[%s1620_s1 + $0x20] sm:$0xff] }
  0x20   : > { %v203_v23 = vadd.f32 %v202_v19, %v190_v12  ;;  %1043 = vmatprep.subr.bf16.mxu1 %v1237_v9  ;;  %v1005_v15 = vpack.c.bf16 %v740_v14, %v739_v13  ;;  %v742_v19 = vld [vmem:[%s1620_s1 + $0x28] sm:$0xff] }
  0x21   : > { %v238_v24 = vrot.slane %v237_v20, 4  ;;  %v247_v25 = vrot.slane %v246_v21, 4  ;;  %v195_v26 = vrot.slane %v194_v22, 4  ;;  %1003 = vmatpush1.bf16.msra.mxu0 %v1002_v10  ;;  %1057 = vmatpush1.bf16.msra.mxu1 %v1002_v10 }
  0x22   : > { %v204_v27 = vrot.slane %v203_v23, 4  ;;  %1004 = vmatprep.subr.bf16.mxu0 %v1237_v9  ;;  %1044 = vmatprep.subr.bf16.mxu1 %v1237_v9 }
  0x23   : > { %v239_v30 = vmax.f32 %v237_v20, %v238_v24  ;;  %v248_v31 = vmax.f32 %v246_v21, %v247_v25  ;;  %v196_v32 = vadd.f32 %v195_v26, %v194_v22  ;;  %v1008_v20 = vpack.c.bf16 %v742_v19, %v741_v18  ;;  %v744_v24 = vld [vmem:[%s1620_s1 + $0x38] sm:$0xff]  ;;  %v762_v18 = vld [vmem:[%s1620_s1 + $0xc8] sm:$0xff] }
  0x24   : > { %v205_v33 = vadd.f32 %v204_v27, %v203_v23  ;;  %v743_v23 = vld [vmem:[%s1620_s1 + $0x30] sm:$0xff] }
  0x25   : > { %v240_v34 = vrot.slane %v239_v30, 2  ;;  %v249_v35 = vrot.slane %v248_v31, 2  ;;  %v197_v36 = vrot.slane %v196_v32, 2  ;;  %1006 = vmatpush1.bf16.msra.mxu0 %v1005_v15  ;;  %1058 = vmatpush1.bf16.msra.mxu1 %v1005_v15  ;;  %v1011_v25 = vpack.c.bf16 %v744_v24, %v743_v23  ;;  %v763_v24 = vld [vmem:[%s1620_s1 + $0xd0] sm:$0xff] }
  0x26   : > { %v206_v38 = vrot.slane %v205_v33, 2  ;;  %1007 = vmatprep.subr.bf16.mxu0 %v1237_v9  ;;  %1045 = vmatprep.subr.bf16.mxu1 %v1237_v9 }
  0x27   : > { %v241_v40 = vmax.f32 %v239_v30, %v240_v34  ;;  %v250_v41 = vmax.f32 %v248_v31, %v249_v35  ;;  %v198_v42 = vadd.f32 %v197_v36, %v196_v32  ;;  %v746_v30 = vld [vmem:[%s1620_s1 + $0x48] sm:$0xff]  ;;  %v747_v36 = vld [vmem:[%s1620_s1 + $0x50] sm:$0xff] }
  0x28   : > { %v207_v43 = vadd.f32 %v206_v38, %v205_v33  ;;  %v1014_v31 = vpack.c.bf16 %v746_v30, %v745_v29  ;;  %v1017_v38 = vpack.c.bf16 %v748_v37, %v747_v36 }
  0x29   : > { %v242_v44 = vrot.slane %v241_v40, 1  ;;  %v251_v45 = vrot.slane %v250_v41, 1  ;;  %v199_v46 = vrot.slane %v198_v42, 1  ;;  %1009 = vmatpush1.bf16.msra.mxu0 %v1008_v20  ;;  %1059 = vmatpush1.bf16.msra.mxu1 %v1008_v20 }
  0x2a   : > { %v208_v47 = vrot.slane %v207_v43, 1  ;;  %1010 = vmatprep.subr.bf16.mxu0 %v1237_v9  ;;  %1046 = vmatprep.subr.bf16.mxu1 %v1237_v9 }
  0x2b   : > { %v243_v49 = vmax.f32 %v241_v40, %v242_v44  ;;  %v252_v50 = vmax.f32 %v250_v41, %v251_v45  ;;  %v200_v51 = vadd.f32 %v199_v46, %v198_v42  ;;  %v749_v42 = vld [vmem:[%s1620_s1 + $0x60] sm:$0xff] }
  0x2c   : > { %v209_v52 = vadd.f32 %v208_v47, %v207_v43  ;;  %v750_v43 = vld [vmem:[%s1620_s1 + $0x68] sm:$0xff] }
  0x2d   : > { %v255_v53 = vcombine.low %v243_v49, %v252_v50  ;;  %1012 = vmatpush1.bf16.msra.mxu0 %v1011_v25  ;;  %1060 = vmatpush1.bf16.msra.mxu1 %v1011_v25  ;;  %v1020_v44 = vpack.c.bf16 %v750_v43, %v749_v42  ;;  %v752_v49 = vld [vmem:[%s1620_s1 + $0x78] sm:$0xff] }
  0x2e   : > { %v212_v54 = vcombine.low %v200_v51, %v209_v52  ;;  %1013 = vmatprep.subr.bf16.mxu0 %v1237_v9  ;;  %1047 = vmatprep.subr.bf16.mxu1 %v1237_v9  ;;  %v764_v25 = vld [vmem:[%s1620_s1 + $0xd8] sm:$0xff] }
  0x2f   : > { %v262_v55 = vrot.slane %v255_v53, %v218_v48 }
  0x30   : > { %v219_v57 = vrot.slane %v212_v54, %v218_v48 }
  0x31   : > { %v269_v58 = vrot.slane %v262_v55, %v218_v48  ;;  %1015 = vmatpush1.bf16.msra.mxu0 %v1014_v31  ;;  %1061 = vmatpush1.bf16.msra.mxu1 %v1014_v31  ;;  %v753_v55 = vld [vmem:[%s1620_s1 + $0x80] sm:$0xff] }
  0x32   : > { %v226_v60 = vrot.slane %v219_v57, %v218_v48  ;;  %1016 = vmatprep.subr.bf16.mxu0 %v1237_v9  ;;  %1048 = vmatprep.subr.bf16.mxu1 %v1237_v9  ;;  %v751_v48 = vld [vmem:[%s1620_s1 + $0x70] sm:$0xff] }
  0x33   : > { %v271_v61 = vmax.f32 %v234_v56, %v269_v58  ;;  %v1023_v50 = vpack.c.bf16 %v752_v49, %v751_v48  ;;  %v754_v56 = vld [vmem:[%s1620_s1 + $0x88] sm:$0xff] }
  0x34   : > { %v228_v62 = vadd.f32 %v226_v60, %v191_v59  ;;  %v1026_v57 = vpack.c.bf16 %v754_v56, %v753_v55 }
  0x35   : > { %272 = vst.msk [vmem:[#allocation3] sm:$0x3] %vm1313_vm1, %v271_v61  ;;  %1018 = vmatpush1.bf16.msra.mxu0 %v1017_v38  ;;  %1062 = vmatpush1.bf16.msra.mxu1 %v1017_v38  ;;  %v755_v61 = vld [vmem:[%s1620_s1 + $0x90] sm:$0xff] }
  0x36   : > { %233 = vst.msk [vmem:[#allocation2] sm:$0x3] %vm1313_vm1, %v228_v62  ;;  %1019 = vmatprep.subr.bf16.mxu0 %v1237_v9  ;;  %1049 = vmatprep.subr.bf16.mxu1 %v1237_v9  ;;  %v756_v62 = vld [vmem:[%s1620_s1 + $0x98] sm:$0xff] }
  0x39   : > { %1021 = vmatpush1.bf16.msra.mxu0 %v1020_v44  ;;  %1063 = vmatpush1.bf16.msra.mxu1 %v1020_v44 }
  0x3a   : > { %1022 = vmatprep.subr.bf16.mxu0 %v1237_v9  ;;  %1050 = vmatprep.subr.bf16.mxu1 %v1237_v9 }
  0x3c   : > { %v967_v63 = vld [vmem:[#allocation3] ss:$0 sm:$0xff]  ;;  %v432_v2 = vld [vmem:[#allocation3 + $0x1] sm:$0x1] }
  0x3d   : > { %v288_v0 = vld [vmem:[#allocation3] sm:$0x1]  ;;  %346 = vrot.lane.b32.xlu1 %v967_v63, %s1230_s28  ;;  %306 = vrot.lane.b32.xlu0 %v967_v63, %s1231_s29  ;;  %433 = vst.msk [vmem:[#allocation5 + $0x10] sm:$0x1] %vm286_vm2, %v432_v2  ;;  %v977_v1 = vld [vmem:[#allocation3 + $0x1] ss:$0 sm:$0xff] }
  0x3e   : > { %289 = vst.msk [vmem:[#allocation5 + $0x8] sm:$0x1] %vm286_vm2, %v288_v0  ;;  %v285_v3 = vld [vmem:[#allocation2] sm:$0x1]  ;;  %v430_v5 = vld [vmem:[#allocation2 + $0x1] sm:$0x1]  ;;  %1024 = vmatpush1.bf16.msra.mxu0 %v1023_v50  ;;  %1064 = vmatpush1.bf16.msra.mxu1 %v1023_v50 }
  0x3f   : > { %287 = vst.msk [vmem:[#allocation4 + $0x8] sm:$0x1] %vm286_vm2, %v285_v3  ;;  %v962_v4 = vld [vmem:[#allocation2] ss:$0 sm:$0xff]  ;;  %431 = vst.msk [vmem:[#allocation4 + $0x10] sm:$0x1] %vm286_vm2, %v430_v5  ;;  %1025 = vmatprep.subr.bf16.mxu0 %v1237_v9  ;;  %1051 = vmatprep.subr.bf16.mxu1 %v1237_v9 }
  0x40   : > { %v976_v6 = vld [vmem:[#allocation2 + $0x1] ss:$0 sm:$0xff]  ;;  %v758_v5 = vld [vmem:[%s1620_s1 + $0xa8] sm:$0xff] }
  0x41   : > { %366 = vrot.lane.b32.xlu1 %v967_v63, %s1232_s30  ;;  %326 = vrot.lane.b32.xlu0 %v967_v63, %s1233_s3 }
  0x42   : > { %1027 = vmatpush1.bf16.msra.mxu0 %v1026_v57  ;;  %1065 = vmatpush1.bf16.msra.mxu1 %v1026_v57 }
  0x43   : > { %1028 = vmatprep.subr.bf16.mxu0 %v1237_v9  ;;  %1052 = vmatprep.subr.bf16.mxu1 %v1237_v9 }
  0x45   : > { %406 = vrot.lane.b32.xlu1 %v967_v63, %s1234_s4  ;;  %386 = vrot.lane.b32.xlu0 %v967_v63, %s1235_s5 }
  0x49   : > { %450 = vrot.lane.b32.xlu1 %v977_v1, %s1231_s29  ;;  %426 = vrot.lane.b32.xlu0 %v967_v63, %s1236_s6  ;;  %v1029_v63 = vpack.c.bf16 %v756_v62, %v755_v61 }
  0x4b   : > { %1030 = vmatpush1.bf16.msra.mxu0 %v1029_v63  ;;  %1066 = vmatpush1.bf16.msra.mxu1 %v1029_v63 }
  0x4c   : > { %1031 = vmatprep.subr.bf16.mxu0 %v1237_v9  ;;  %1053 = vmatprep.subr.bf16.mxu1 %v1237_v9 }
  0x4d   : > { %490 = vrot.lane.b32.xlu1 %v977_v1, %s1230_s28  ;;  %470 = vrot.lane.b32.xlu0 %v977_v1, %s1233_s3 }
  0x51   : > { %510 = vrot.lane.b32.xlu0 %v977_v1, %s1232_s30  ;;  %296 = vrot.lane.b32.xlu1 %v962_v4, %s1231_s29 }
  0x55   : > { %316 = vrot.lane.b32.xlu0 %v962_v4, %s1233_s3  ;;  %336 = vrot.lane.b32.xlu1 %v962_v4, %s1230_s28 }
  0x59   : > { %356 = vrot.lane.b32.xlu0 %v962_v4, %s1232_s30  ;;  %376 = vrot.lane.b32.xlu1 %v962_v4, %s1235_s5 }
  0x5d   : > { %396 = vrot.lane.b32.xlu0 %v962_v4, %s1234_s4  ;;  %416 = vrot.lane.b32.xlu1 %v962_v4, %s1236_s6  ;;  %v757_v4 = vld [vmem:[%s1620_s1 + $0xa0] sm:$0xff] }
  0x61   : > { %440 = vrot.lane.b32.xlu0 %v976_v6, %s1231_s29  ;;  %460 = vrot.lane.b32.xlu1 %v976_v6, %s1233_s3 }
  0x65   : > { %480 = vrot.lane.b32.xlu0 %v976_v6, %s1230_s28  ;;  %500 = vrot.lane.b32.xlu1 %v976_v6, %s1232_s30 }
  0x69   : > { %520 = vrot.lane.b32.xlu0 %v976_v6, %s1235_s5  ;;  %530 = vrot.lane.b32.xlu1 %v977_v1, %s1235_s5 }
  0x6d   : > { %550 = vrot.lane.b32.xlu0 %v977_v1, %s1234_s4  ;;  %540 = vrot.lane.b32.xlu1 %v976_v6, %s1234_s4 }
  0x71   : > { %570 = vrot.lane.b32.xlu0 %v977_v1, %s1236_s6  ;;  %560 = vrot.lane.b32.xlu1 %v976_v6, %s1236_s6  ;;  %v1032_v6 = vpack.c.bf16 %v758_v5, %v757_v4 }
  0x73   : > { %1033 = vmatpush1.bf16.msra.mxu0 %v1032_v6  ;;  %1067 = vmatpush1.bf16.msra.mxu1 %v1032_v6 }
  0x74   : > { %1034 = vmatprep.subr.bf16.mxu0 %v1237_v9  ;;  %1054 = vmatprep.subr.bf16.mxu1 %v1237_v9 }
  0xaf   : > { %v347_v11 = vpop.permute.xlu1 %346  ;;  %v307_v12 = vpop.permute.xlu0 %306 }
  0xb0   : > { %349 = vst.msk [vmem:[#allocation5 + $0xb] sm:$0x1] %vm286_vm2, %v347_v11  ;;  %309 = vst.msk [vmem:[#allocation5 + $0x9] sm:$0x1] %vm286_vm2, %v307_v12  ;;  %v759_v11 = vld [vmem:[%s1620_s1 + $0xb0] sm:$0xff]  ;;  %v760_v12 = vld [vmem:[%s1620_s1 + $0xb8] sm:$0xff] }
  0xb1   : > { %v1035_v13 = vpack.c.bf16 %v760_v12, %v759_v11 }
  0xb3   : > { %v367_v16 = vpop.permute.xlu1 %366  ;;  %v327_v17 = vpop.permute.xlu0 %326  ;;  %1036 = vmatpush1.bf16.msra.mxu0 %v1035_v13  ;;  %1068 = vmatpush1.bf16.msra.mxu1 %v1035_v13 }
  0xb4   : > { %369 = vst.msk [vmem:[#allocation5 + $0xc] sm:$0x1] %vm286_vm2, %v367_v16  ;;  %329 = vst.msk [vmem:[#allocation5 + $0xa] sm:$0x1] %vm286_vm2, %v327_v17  ;;  %v761_v17 = vld [vmem:[%s1620_s1 + $0xc0] sm:$0xff]  ;;  %1037 = vmatprep.subr.bf16.mxu0 %v1237_v9  ;;  %1055 = vmatprep.subr.bf16.mxu1 %v1237_v9 }
  0xb5   : > { %v1038_v19 = vpack.c.bf16 %v762_v18, %v761_v17 }
  0xb7   : > { %v407_v21 = vpop.permute.xlu1 %406  ;;  %v387_v22 = vpop.permute.xlu0 %386  ;;  %1039 = vmatpush1.bf16.msra.mxu0 %v1038_v19  ;;  %1069 = vmatpush1.bf16.msra.mxu1 %v1038_v19 }
  0xb8   : > { %409 = vst.msk [vmem:[#allocation5 + $0xe] sm:$0x1] %vm286_vm2, %v407_v21  ;;  %389 = vst.msk [vmem:[#allocation5 + $0xd] sm:$0x1] %vm286_vm2, %v387_v22  ;;  %1040 = vmatprep.subr.bf16.mxu0 %v1237_v9  ;;  %1056 = vmatprep.subr.bf16.mxu1 %v1237_v9 }
  0xbb   : > { %v451_v26 = vpop.permute.xlu1 %450  ;;  %v427_v27 = vpop.permute.xlu0 %426  ;;  %v578_v28 = vld [vmem:[#allocation5 + $0x5] sm:$0xff] }
  0xbc   : > { %453 = vst.msk [vmem:[#allocation5 + $0x11] sm:$0x1] %vm286_vm2, %v451_v26  ;;  %429 = vst.msk [vmem:[#allocation5 + $0xf] sm:$0x1] %vm286_vm2, %v427_v27  ;;  %582 = vrot.lane.b32.xlu0 %v578_v28, %s1231_s29  ;;  %v1041_v26 = vpack.c.bf16 %v764_v25, %v763_v24 }
  0xbe   : > { %1042 = vmatpush1.bf16.msra.mxu0 %v1041_v26  ;;  %1070 = vmatpush1.bf16.msra.mxu1 %v1041_v26 }
  0xbf   : > { %v491_v32 = vpop.permute.xlu1 %490  ;;  %v471_v33 = vpop.permute.xlu0 %470  ;;  %v621_v34 = vld [vmem:[#allocation5 + $0x7] sm:$0xff] }
  0xc0   : > { %v604_v35 = vld [vmem:[#allocation5 + $0x6] sm:$0xff]  ;;  %493 = vst.msk [vmem:[#allocation5 + $0x13] sm:$0x1] %vm286_vm2, %v491_v32  ;;  %473 = vst.msk [vmem:[#allocation5 + $0x12] sm:$0x1] %vm286_vm2, %v471_v33  ;;  %625 = vrot.lane.b32.xlu0 %v621_v34, %s1236_s6 }
  0xc1   : > { %606 = vst.msk [vmem:[#allocation6 + $0x8] sm:$0xff] %vm276_vm0, %v604_v35 }
  0xc3   : > { %v511_v39 = vpop.permute.xlu0 %510  ;;  %v297_v40 = vpop.permute.xlu1 %296  ;;  %v646_v41 = vld [vmem:[#allocation5 + $0x8] sm:$0xff] }
  0xc4   : > { %513 = vst.msk [vmem:[#allocation5 + $0x14] sm:$0x1] %vm286_vm2, %v511_v39  ;;  %299 = vst.msk [vmem:[#allocation4 + $0x9] sm:$0x1] %vm286_vm2, %v297_v40  ;;  %650 = vrot.lane.b32.xlu0 %v646_v41, %s1234_s4  ;;  %v671_v47 = vld [vmem:[#allocation5 + $0x9] sm:$0xff] }
  0xc5   : > { %v696_v51 = vld [vmem:[#allocation5 + $0xa] sm:$0xff] }
  0xc7   : > { %v317_v45 = vpop.permute.xlu0 %316  ;;  %v337_v46 = vpop.permute.xlu1 %336  ;;  %v721_v60 = vld [vmem:[#allocation5 + $0xb] sm:$0xff] }
  0xc8   : > { %319 = vst.msk [vmem:[#allocation4 + $0xa] sm:$0x1] %vm286_vm2, %v317_v45  ;;  %339 = vst.msk [vmem:[#allocation4 + $0xb] sm:$0x1] %vm286_vm2, %v337_v46  ;;  %675 = vrot.lane.b32.xlu0 %v671_v47, %s1235_s5 }
  0xcb   : > { %v357_v52 = vpop.permute.xlu0 %356  ;;  %v377_v53 = vpop.permute.xlu1 %376  ;;  %v579_v54 = vld [vmem:[#allocation5 + $0xd] sm:$0xff] }
  0xcc   : > { %359 = vst.msk [vmem:[#allocation4 + $0xc] sm:$0x1] %vm286_vm2, %v357_v52  ;;  %379 = vst.msk [vmem:[#allocation4 + $0xd] sm:$0x1] %vm286_vm2, %v377_v53  ;;  %700 = vrot.lane.b32.xlu0 %v696_v51, %s1232_s30  ;;  %584 = vrot.lane.b32.xlu1 %v579_v54, %s1231_s29 }
  0xcf   : > { %v397_v58 = vpop.permute.xlu0 %396  ;;  %v417_v59 = vpop.permute.xlu1 %416 }
  0xd0   : > { %399 = vst.msk [vmem:[#allocation4 + $0xe] sm:$0x1] %vm286_vm2, %v397_v58  ;;  %419 = vst.msk [vmem:[#allocation4 + $0xf] sm:$0x1] %vm286_vm2, %v417_v59  ;;  %725 = vrot.lane.b32.xlu0 %v721_v60, %s1230_s28 }
  0xd3   : > { %v441_v0 = vpop.permute.xlu0 %440  ;;  %v461_v2 = vpop.permute.xlu1 %460  ;;  %v591_v1 = vld [vmem:[#allocation4 + $0x6] sm:$0xff] }
  0xd4   : > { %v574_v3 = vld [vmem:[#allocation4 + $0x5] sm:$0xff]  ;;  %443 = vst.msk [vmem:[#allocation4 + $0x11] sm:$0x1] %vm286_vm2, %v441_v0  ;;  %463 = vst.msk [vmem:[#allocation4 + $0x12] sm:$0x1] %vm286_vm2, %v461_v2  ;;  %595 = vrot.lane.b32.xlu0 %v591_v1, %s1236_s6 }
  0xd5   : > { %576 = vst.msk [vmem:[#allocation6] sm:$0xff] %vm276_vm0, %v574_v3 }
  0xd7   : > { %v481_v7 = vpop.permute.xlu0 %480  ;;  %v501_v8 = vpop.permute.xlu1 %500  ;;  %v608_v10 = vld [vmem:[#allocation4 + $0x7] sm:$0xff] }
  0xd8   : > { %483 = vst.msk [vmem:[#allocation4 + $0x13] sm:$0x1] %vm286_vm2, %v481_v7  ;;  %503 = vst.msk [vmem:[#allocation4 + $0x14] sm:$0x1] %vm286_vm2, %v501_v8  ;;  %612 = vrot.lane.b32.xlu0 %v608_v10, %s1234_s4  ;;  %v633_v16 = vld [vmem:[#allocation4 + $0x8] sm:$0xff] }
  0xd9   : > { %v658_v20 = vld [vmem:[#allocation4 + $0x9] sm:$0xff] }
  0xdb   : > { %v521_v14 = vpop.permute.xlu0 %520  ;;  %v531_v15 = vpop.permute.xlu1 %530  ;;  %v683_v29 = vld [vmem:[#allocation4 + $0xa] sm:$0xff] }
  0xdc   : > { %523 = vst.msk [vmem:[#allocation4 + $0x15] sm:$0x1] %vm286_vm2, %v521_v14  ;;  %533 = vst.msk [vmem:[#allocation5 + $0x15] sm:$0x1] %vm286_vm2, %v531_v15  ;;  %637 = vrot.lane.b32.xlu0 %v633_v16, %s1235_s5  ;;  %v708_v32 = vld [vmem:[#allocation4 + $0xb] sm:$0xff] }
  0xdf   : > { %v551_v21 = vpop.permute.xlu0 %550  ;;  %v541_v22 = vpop.permute.xlu1 %540  ;;  %v575_v23 = vld [vmem:[#allocation4 + $0xd] sm:$0xff] }
  0xe0   : > { %553 = vst.msk [vmem:[#allocation5 + $0x16] sm:$0x1] %vm286_vm2, %v551_v21  ;;  %543 = vst.msk [vmem:[#allocation4 + $0x16] sm:$0x1] %vm286_vm2, %v541_v22  ;;  %662 = vrot.lane.b32.xlu0 %v658_v20, %s1232_s30 }
  0xe1   : > { %577 = vst.msk [vmem:[#allocation6 + $0x10] sm:$0xff] %vm276_vm0, %v575_v23 }
  0xe3   : > { %v571_v27 = vpop.permute.xlu0 %570  ;;  %v561_v28 = vpop.permute.xlu1 %560  ;;  %v605_v30 = vld [vmem:[#allocation5 + $0xe] sm:$0xff] }
  0xe4   : > { %573 = vst.msk [vmem:[#allocation5 + $0x17] sm:$0x1] %vm286_vm2, %v571_v27  ;;  %563 = vst.msk [vmem:[#allocation4 + $0x17] sm:$0x1] %vm286_vm2, %v561_v28  ;;  %687 = vrot.lane.b32.xlu0 %v683_v29, %s1230_s28  ;;  %v592_v36 = vld [vmem:[#allocation4 + $0xe] sm:$0xff] }
  0xe5   : > { %607 = vst.msk [vmem:[#allocation6 + $0x18] sm:$0xff] %vm276_vm0, %v605_v30 }
  0xe7   : > { %v622_v31 = vld [vmem:[#allocation5 + $0xf] sm:$0xff] }
  0xe8   : > { %627 = vrot.lane.b32.xlu1 %v622_v31, %s1236_s6  ;;  %712 = vrot.lane.b32.xlu0 %v708_v32, %s1233_s3  ;;  %v609_v37 = vld [vmem:[#allocation4 + $0xf] sm:$0xff] }
  0xeb   : > { %v647_v9 = vld [vmem:[#allocation5 + $0x10] sm:$0xff] }
  0xec   : > { %652 = vrot.lane.b32.xlu1 %v647_v9, %s1234_s4  ;;  %v672_v33 = vld [vmem:[#allocation5 + $0x11] sm:$0xff] }
  0xed   : > { %v697_v34 = vld [vmem:[#allocation5 + $0x12] sm:$0xff] }
  0xee   : > { %v722_v35 = vld [vmem:[#allocation5 + $0x13] sm:$0xff] }
  0xef   : > { %v634_v38 = vld [vmem:[#allocation4 + $0x10] sm:$0xff] }
  0xf0   : > { %677 = vrot.lane.b32.xlu1 %v672_v33, %s1235_s5  ;;  %v659_v39 = vld [vmem:[#allocation4 + $0x11] sm:$0xff] }
  0xf1   : > { %v684_v40 = vld [vmem:[#allocation4 + $0x12] sm:$0xff] }
  0xf2   : > { %v709_v41 = vld [vmem:[#allocation4 + $0x13] sm:$0xff] }
  0xf4   : > { %702 = vrot.lane.b32.xlu1 %v697_v34, %s1232_s30 }
  0xf8   : > { %727 = vrot.lane.b32.xlu1 %v722_v35, %s1230_s28 }
  0xfc   : > { %597 = vrot.lane.b32.xlu1 %v592_v36, %s1236_s6 }
 0x100   : > { %614 = vrot.lane.b32.xlu1 %v609_v37, %s1234_s4  ;;  %s1000_s4 = sshll.u32 %s1217_s12, 8  ;;  %s1238_s12 = smov [#allocation7]  }
 0x101   : > { %s1568_s7 = scalar_lea.hbm %s1621_s2, %s1000_s4  ;;  %s1151_s16 = sshll.u32 %s1238_s12, 4  ;;  %s1152_s16 = int_to_ptr.vmem [resolvable:$false] %s1151_s16 }
 0x102   : > { %s1153_s18 = scalar_lea.vmem %s1152_s16, 512 }
 0x104   : > { %639 = vrot.lane.b32.xlu1 %v634_v38, %s1235_s5 }
 0x108   : > { %664 = vrot.lane.b32.xlu1 %v659_v39, %s1232_s30 }
 0x10c   : > { %689 = vrot.lane.b32.xlu1 %v684_v40, %s1230_s28  ;;  %s159_s28 = sand.u32 1, %s1209_s10  }
 0x10d   : > { %s959_s30 = sshll.u32 %s159_s28, 4  ;;  %s1573_s8 = scalar_lea.sflag [#allocation8], %s159_s28 }
 0x110   : > { %714 = vrot.lane.b32.xlu1 %v709_v41, %s1233_s3  ;;  %s161_s3 = scalar_lea.vmem [#allocation7], %s959_s30 }
 0x111   : > { %s875_s5 = sshll.u32 %s161_s3, 4  ;;  %s1570_s5 = int_to_ptr.vmem [resolvable:$true] %s875_s5 }
 0x112   : > { %s1147_s15 = scalar_lea.vmem %s1570_s5, 256  ;;  %p1154_p1 = scmp.lt.s32.totalorder %s1570_s5, %s1152_s16 }
 0x113   : > { %p1148_p12 = scmp.ne.s32.totalorder %s1570_s5, %s1147_s15  ;;  %p1155_p2 = scmp.lt.s32.totalorder %s1153_s18, %s1147_s15 }
 0x115   : > { %p1149_p13 = pnand %p1148_p12, %p1296_p4  ;;  %p1156_p3 = por %p1155_p2, %p1154_p1 }
 0x117   : > { %p1150_p0 = pneg %p1149_p13 }
 0x119   : > { %p1157_p5 = pnand %p1156_p3, %p1150_p0 }
 0x12e   : > { %v583_v42 = vpop.permute.xlu0 %582 }
 0x12f   : > { %589 = vst.msk [vmem:[#allocation6] sm:$0xff] %vm588_vm3, %v583_v42 }
 0x132   : > { %v626_v43 = vpop.permute.xlu0 %625 }
 0x133   : > { %631 = vst.msk [vmem:[#allocation6 + $0x8] sm:$0xff] %vm601_vm4, %v626_v43 }
 0x136   : > { %v651_v44 = vpop.permute.xlu0 %650 }
 0x137   : > { %656 = vst.msk [vmem:[#allocation6 + $0x8] sm:$0xff] %vm618_vm5, %v651_v44 }
 0x13a   : > { %v676_v45 = vpop.permute.xlu0 %675 }
 0x13b   : > { %681 = vst.msk [vmem:[#allocation6 + $0x8] sm:$0xff] %vm643_vm6, %v676_v45 }
 0x13e   : > { %v701_v46 = vpop.permute.xlu0 %700  ;;  %v585_v47 = vpop.permute.xlu1 %584 }
 0x13f   : > { %706 = vst.msk [vmem:[#allocation6 + $0x8] sm:$0xff] %vm668_vm7, %v701_v46 }
 0x140   : > { %590 = vst.msk [vmem:[#allocation6 + $0x10] sm:$0xff] %vm588_vm3, %v585_v47 }
 0x142   : > { %v726_v48 = vpop.permute.xlu0 %725 }
 0x143   : > { %731 = vst.msk [vmem:[#allocation6 + $0x8] sm:$0xff] %vm693_vm8, %v726_v48 }
 0x146   : > { %v596_v49 = vpop.permute.xlu0 %595 }
 0x147   : > { %602 = vst.msk [vmem:[#allocation6] sm:$0xff] %vm601_vm4, %v596_v49 }
 0x14a   : > { %v613_v50 = vpop.permute.xlu0 %612  ;;  %v734_v51 = vld [vmem:[#allocation6 + $0x8] sm:$0xff] }
 0x14b   : > { %619 = vst.msk [vmem:[#allocation6] sm:$0xff] %vm618_vm5, %v613_v50  ;;  %990 = vmatprep.mubr.msk.f32.mxu0 %vm765_vm9, %v734_v51 }
 0x14e   : > { %v638_v52 = vpop.permute.xlu0 %637 }
 0x14f   : > { %644 = vst.msk [vmem:[#allocation6] sm:$0xff] %vm643_vm6, %v638_v52 }
 0x152   : > { %v663_v53 = vpop.permute.xlu0 %662 }
 0x153   : > { %669 = vst.msk [vmem:[#allocation6] sm:$0xff] %vm668_vm7, %v663_v53 }
 0x156   : > { %v688_v54 = vpop.permute.xlu0 %687 }
 0x157   : > { %694 = vst.msk [vmem:[#allocation6] sm:$0xff] %vm693_vm8, %v688_v54 }
 0x15a   : > { %v628_v55 = vpop.permute.xlu1 %627  ;;  %v713_v56 = vpop.permute.xlu0 %712 }
 0x15b   : > { %632 = vst.msk [vmem:[#allocation6 + $0x18] sm:$0xff] %vm601_vm4, %v628_v55 }
 0x15c   : > { %719 = vst.msk [vmem:[#allocation6] sm:$0xff] %vm718_vm10, %v713_v56 }
 0x15e   : > { %v653_v57 = vpop.permute.xlu1 %652 }
 0x15f   : > { %657 = vst.msk [vmem:[#allocation6 + $0x18] sm:$0xff] %vm618_vm5, %v653_v57 }
 0x162   : > { %v678_v58 = vpop.permute.xlu1 %677 }
 0x163   : > { %v733_v59 = vld [vmem:[#allocation6] sm:$0xff]  ;;  %682 = vst.msk [vmem:[#allocation6 + $0x18] sm:$0xff] %vm643_vm6, %v678_v58 }
 0x164   : > { %837 = vmatmul.mubr.f32.vlgmr.msra.gmra.mrb[0].mxu0 %v733_v59 }
 0x166   : > { %v703_v60 = vpop.permute.xlu1 %702 }
 0x167   : > { %707 = vst.msk [vmem:[#allocation6 + $0x18] sm:$0xff] %vm668_vm7, %v703_v60 }
 0x16a   : > { %v728_v61 = vpop.permute.xlu1 %727 }
 0x16b   : > { %732 = vst.msk [vmem:[#allocation6 + $0x18] sm:$0xff] %vm693_vm8, %v728_v61 }
 0x16e   : > { %v598_v62 = vpop.permute.xlu1 %597 }
 0x16f   : > { %603 = vst.msk [vmem:[#allocation6 + $0x10] sm:$0xff] %vm601_vm4, %v598_v62 }
 0x172   : > { %v615_v63 = vpop.permute.xlu1 %614  ;;  %v736_v0 = vld [vmem:[#allocation6 + $0x18] sm:$0xff] }
 0x173   : > { %620 = vst.msk [vmem:[#allocation6 + $0x10] sm:$0xff] %vm618_vm5, %v615_v63  ;;  %991 = vmatprep.mubr.msk.f32.mxu1 %vm765_vm9, %v736_v0 }
 0x176   : > { %v640_v2 = vpop.permute.xlu1 %639 }
 0x177   : > { %645 = vst.msk [vmem:[#allocation6 + $0x10] sm:$0xff] %vm643_vm6, %v640_v2 }
 0x17a   : > { %v665_v1 = vpop.permute.xlu1 %664 }
 0x17b   : > { %670 = vst.msk [vmem:[#allocation6 + $0x10] sm:$0xff] %vm668_vm7, %v665_v1 }
 0x17e   : > { %v690_v3 = vpop.permute.xlu1 %689 }
 0x17f   : > { %695 = vst.msk [vmem:[#allocation6 + $0x10] sm:$0xff] %vm693_vm8, %v690_v3 }
 0x182   : > { %v715_v4 = vpop.permute.xlu1 %714 }
 0x183   : > { %720 = vst.msk [vmem:[#allocation6 + $0x10] sm:$0xff] %vm718_vm10, %v715_v4 }
 0x18a   : > { %v735_v5 = vld [vmem:[#allocation6 + $0x10] sm:$0xff] }
 0x18b   : > { %842 = vmatmul.mubr.f32.vlgmr.msra.gmra.mrb[0].mxu1 %v735_v5 }
 0x237   : > { %v838_v6 = vpop.f32.mrb[0].mxu0 }
 0x238   : > { %v992_v7 = vmul.f32 -1.442695, %v838_v6  ;;  %v840_v8 = vpop.f32.mrb[1].mxu0 }
 0x23a   : > { %1139 = vpow2.f32 %v992_v7 }
 0x244   : > { %v1140_v10 = vpop.eup %1139 }
 0x245   : > { %v853_v11 = vadd.f32 1.0, %v1140_v10 }
 0x247   : > { %1141 = vrcp.f32 %v853_v11 }
 0x251   : > { %v1142_v12 = vpop.eup %1141 }
 0x252   : > { %859 = vst.msk [vmem:[%s161_s3] sm:$0xff] %vm276_vm0, %v1142_v12 }
 0x25e   : > { %v843_v13 = vpop.f32.mrb[0].mxu1 }
 0x25f   : > { %v993_v14 = vmul.f32 -1.442695, %v843_v13  ;;  %v845_v15 = vpop.f32.mrb[1].mxu1 }
 0x261   : > { %1143 = vpow2.f32 %v993_v14 }
 0x26b   : > { %v1144_v16 = vpop.eup %1143 }
 0x26c   : > { %v854_v17 = vadd.f32 1.0, %v1144_v16 }
 0x26e   : > { %1145 = vrcp.f32 %v854_v17 }
 0x278   : > { %v1146_v18 = vpop.eup %1145 }
 0x279   : > { %860 = vst.msk [vmem:[%s161_s3 + $0x8] sm:$0xff] %vm276_vm0, %v1146_v18 }
 0x27a   : > { %1160 = shalt.err (!%p1157_p5)
}
 0x27b   : > { %s1161_s20 = scalar_lea.hbm %s1568_s7, 256  ;;  %s1165_s24 = scalar_lea.hbm %s1621_s2, 512 }
 0x27c   : > { %p1162_p6 = scmp.ne.s32.totalorder %s1568_s7, %s1161_s20  ;;  %p1166_p10 = scmp.lt.u32.totalorder %s1568_s7, %s1621_s2 }
 0x27d   : > { %p1167_p11 = scmp.lt.u32.totalorder %s1165_s24, %s1161_s20  ;;  %p1169_p13 = scmp.lt.u32.totalorder %s1161_s20, %s1568_s7 }
 0x27e   : > { %p1163_p7 = pnand %p1162_p6, %p1296_p4 }
 0x27f   : > { %p1168_p12 = por %p1167_p11, %p1166_p10 }
 0x280   : > { %p1164_p9 = pneg %p1163_p7 }
 0x281   : > { %p1170_p0 = por %p1169_p13, %p1168_p12 }
 0x283   : > { %p1171_p1 = pnand %p1170_p0, %p1164_p9 }
 0x285   : > { %1174 = shalt.err (!%p1171_p1)
}
 0x286   : > { %s1239_s28 = smov 128   ;;  %s1240_s30 = smov 8  }
 0x287   : > { %1071 = dma.vmem_to_hbm [thread:$0]  (%p1296_p4), %s1570_s5, 256, %s1568_s7, %s1573_s8, %s1239_s28, %s1239_s28, %s1240_s30  }
 0x288 PF: > { %p1077_p2 = scmp.ge.s32.totalorder %s1225_s14, 2  ;;  %s890_s3 = sand.u32 1, %s1205_s9  }
 0x289   : > { %s891_s4 = scalar_lea.sflag [#allocation8], %s890_s3 }
 0x28a   : > { %p1074_p3 = pnand %p1077_p2, %p1303_p8 }
 0x28c   : > { %1200 = dma.done.wait (!%p1074_p3), %s891_s4, 256  }
 0x28d   : > { %1202 = vsyncadd (!%p1074_p3), %s891_s4, 4294967040  ;;  %s15_s14 = sadd.s32 1, %s1225_s14   ;;  %s1626_s9 = smov %s1209_s10 }
 0x28e   : > { %p12_p5 = scmp.ge.s32.totalorder %s15_s14, 4   ;;  %s1627_s10 = smov %s1213_s11 }
 0x28f   : > { %s1628_s11 = smov %s1309_s22  ;;  %s1629_s12 = smov %s1221_s13 }
 0x290   : > { %s1630_s13 = smov %s1632_s17  ;;  %14 = sbr.rel (!%p12_p5) target bundleno = 4 (0x4), region = 71 }
 0x297   :  { %896 = vsyncpa [#allocation8], 1 }
 0x298   :  { %898 = vsyncpa [#allocation8 + $0x1], 1 }

</bundles_post_ra>
